<compile_context>
chip_gen: v7x
topology: tpu7x:2x2x1
jax: 0.10.0
libtpu: 0.0.40
codegen_flags: <defaults>
</compile_context>

<pallas_src>
import functools
import math

import jax
import jax.numpy as jnp
from jax import lax
from jax.experimental import pallas as pl
from jax.experimental.pallas import tpu as pltpu

LANE = 128
SUBLANE = 8
MXU_DTYPE = jnp.bfloat16  # MXU operand / resident-activation dtype (f32 accumulation).


def _round_up(v, m):
    return (v + m - 1) // m * m


def _vmem_capacity_bytes():
    try:
        info = pltpu.get_tpu_info()
        cap = getattr(info, "vmem_capacity_bytes", None)
        if cap:
            return int(cap)
    except Exception:
        pass
    return 64 << 20  # conservative (v7x per-TensorCore)


def _mlp_kernel(woff_ref, kt_ref,                      # scalar prefetch (SMEM)
                x_ref, w_ref, b_ref, g_ref, be_ref, alpha_ref,
                o_ref,
                act_ref, h_ref, acc_ref, sum_ref, sq_ref, scale_ref, shift_ref,
                *, n_true, tile_n, tk, n_layers, eps,
                k0_tiles, n_hid_k_tiles, n_hid_pad, out_pad, mask_last_tile):
    del woff_ref  # only used inside the weight index_map
    p = pl.program_id(0)                      # layer index ("phase", outermost)
    t = pl.program_id(1)                      # batch-row tile index
    k = pl.program_id(2)                      # contraction (K) tile within the layer
    last = n_layers - 1
    n_tiles = pl.num_programs(1)
    row0 = pl.multiple_of(t * tile_n, tile_n)
    kt_p = kt_ref[p]                          # active K tiles for layer p (SMEM scalar)

    # --- phase start: fold the previous layer's (now complete) BN statistics into a
    #     per-feature scale/shift, then reset the accumulators. ---
    @pl.when(jnp.logical_and(jnp.logical_and(t == 0, k == 0), p > 0))
    def _finalize_prev_stats():
        inv_n = jnp.float32(1.0 / n_true)
        mean = sum_ref[...] * inv_n                                   # (1, N_max_pad)
        # TODO(synk): single-pass E[x^2]-E[x]^2 can cancel for large-mean activations;
        #             a Welford / second pass over the resident act slab would be more robust.
        var = jnp.maximum(sq_ref[...] * inv_n - mean * mean, 0.0)     # biased variance
        scale = g_ref[0] * lax.rsqrt(var + eps)                       # gamma of layer p-1
        scale_ref[...] = scale
        shift_ref[...] = be_ref[0] - mean * scale                     # beta  of layer p-1

    @pl.when(jnp.logical_and(t == 0, k == 0))
    def _reset_stats():
        sum_ref[...] = jnp.zeros_like(sum_ref)
        sq_ref[...] = jnp.zeros_like(sq_ref)

    # --- build the current layer's input tile once per (p, t), chunked along K for the
    #     K-tiled matmul (h_ref holds (max_k_tiles, tile_n, tk) in the MXU dtype). ---
    @pl.when(jnp.logical_and(k == 0, p == 0))
    def _input_from_x():
        xv = x_ref[...].astype(h_ref.dtype)
        for j in range(k0_tiles):
            h_ref[j] = xv[:, j * tk:(j + 1) * tk]

    @pl.when(jnp.logical_and(k == 0, p > 0))
    def _input_from_prev_layer():
        pre = act_ref[pl.ds(row0, tile_n), :].astype(jnp.float32)     # (tile_n, n_hid_pad)
        scale = scale_ref[...]
        shift = shift_ref[...]
        z = pre * scale[:, :n_hid_pad] + shift[:, :n_hid_pad]         # folded BatchNorm affine
        alpha = alpha_ref[p]                                          # PReLU alpha of layer p-1
        a = jnp.where(z >= 0.0, z, alpha * z).astype(h_ref.dtype)
        for j in range(n_hid_k_tiles):
            h_ref[j] = a[:, j * tk:(j + 1) * tk]

    # --- Linear: K-tiled MXU matmul, f32 accumulation; bias folded into the init ---
    @pl.when(k == 0)
    def _init_acc():
        acc_ref[...] = jnp.zeros_like(acc_ref) + b_ref[0]

    @pl.when(k < kt_p)
    def _accumulate():
        acc_ref[...] += jnp.dot(h_ref[k], w_ref[...],
                                preferred_element_type=jnp.float32)

    # --- hidden layers: stash pre-activations (bf16) + accumulate BN statistics ---
    @pl.when(jnp.logical_and(k == kt_p - 1, p < last))
    def _stash_and_accumulate():
        y = acc_ref[...]
        act_ref[pl.ds(row0, tile_n), :] = y[:, :n_hid_pad].astype(act_ref.dtype)

        def _add_stats(v):
            sum_ref[...] += jnp.sum(v, axis=0, keepdims=True)
            sq_ref[...] += jnp.sum(v * v, axis=0, keepdims=True)

        if mask_last_tile:   # static: only the final tile can contain padded batch rows
            @pl.when(t == n_tiles - 1)
            def _masked():
                rows = row0 + lax.broadcasted_iota(jnp.int32, (tile_n, 1), 0)
                _add_stats(jnp.where(rows < n_true, y, 0.0))

            @pl.when(t != n_tiles - 1)
            def _unmasked():
                _add_stats(y)
        else:
            _add_stats(y)

    # --- last layer: plain Linear output (no BN / activation), real (lane-dense) width ---
    @pl.when(jnp.logical_and(k == kt_p - 1, p == last))
    def _write_output():
        y = acc_ref[...]
        o_ref[...] = y[:, :out_pad].astype(o_ref.dtype)


def init_linear_layer_params(key, in_dim, h_dims):
    """Parameter init mirroring LinearLayer.__init__ shapes (last layer has no BN/PReLU)."""
    params = []
    d_in = in_dim
    n_layers = len(h_dims)
    for i, d_out in enumerate(h_dims):
        key, kw, kb = jax.random.split(key, 3)
        bound = 1.0 / (d_in ** 0.5)
        layer = dict(
            w=jax.random.uniform(kw, (d_in, d_out), jnp.float32, -bound, bound),
            b=jax.random.uniform(kb, (d_out,), jnp.float32, -bound, bound),
        )
        if i != n_layers - 1:
            layer["gamma"] = jnp.ones((d_out,), jnp.float32)    # BatchNorm1d weight init
            layer["beta"] = jnp.zeros((d_out,), jnp.float32)    # BatchNorm1d bias init
            layer["alpha"] = jnp.float32(0.25)                  # PReLU init
        params.append(layer)
        d_in = d_out
    return params


def pack_linear_layer_params(params, in_dim):
    """Ragged (per-layer K) packing: W flat along K, each layer zero-padded to its own
    128-multiples; per-feature params padded to the max layer width only."""
    n_layers = len(params)
    h_dims = [int(p["w"].shape[1]) for p in params]
    in_dims = [int(in_dim)] + h_dims[:-1]
    k_pads = [_round_up(d, LANE) for d in in_dims]       # per-layer contraction pad
    n_pads = [_round_up(d, LANE) for d in h_dims]        # per-layer output pad
    n_max_pad = max(n_pads)
    n_hid_pad = max(n_pads[:-1]) if n_layers > 1 else LANE
    itm = jnp.dtype(MXU_DTYPE).itemsize

    # contraction tile: largest 128-multiple that divides every layer's padded K and keeps the
    # double-buffered weight slab small.
    g = functools.reduce(math.gcd, k_pads)
    tk = LANE
    for cand in (2048, 1024, 512, 256, 128):
        if g % cand == 0 and 2 * cand * n_max_pad * itm <= (8 << 20):
            tk = cand
            break
    k_tiles = [kp // tk for kp in k_pads]
    w_off = [0] * n_layers
    for i in range(1, n_layers):
        w_off[i] = w_off[i - 1] + k_tiles[i - 1]
    total_k = sum(k_pads)

    w_flat = jnp.zeros((total_k, n_max_pad), MXU_DTYPE)
    b_stack = jnp.zeros((n_layers, 1, n_max_pad), jnp.float32)
    g_stack = jnp.zeros((n_layers, 1, n_max_pad), jnp.float32)    # slot i: gamma of layer i-1
    be_stack = jnp.zeros((n_layers, 1, n_max_pad), jnp.float32)   # slot i: beta  of layer i-1
    a_stack = jnp.zeros((n_layers,), jnp.float32)                 # slot i: alpha of layer i-1

    row = 0
    for i, prm in enumerate(params):
        d_in, d_out = in_dims[i], h_dims[i]
        w_flat = w_flat.at[row:row + d_in, :d_out].set(prm["w"].astype(MXU_DTYPE))
        b_stack = b_stack.at[i, 0, :d_out].set(prm["b"].reshape(-1))
        if i + 1 < n_layers:   # this layer's BN/PReLU is consumed at the start of phase i+1
            g_stack = g_stack.at[i + 1, 0, :d_out].set(prm["gamma"].reshape(-1))
            be_stack = be_stack.at[i + 1, 0, :d_out].set(prm["beta"].reshape(-1))
            a_stack = a_stack.at[i + 1].set(jnp.asarray(prm["alpha"], jnp.float32).reshape(()))
        row += k_pads[i]

    return dict(
        w=w_flat, b=b_stack, gamma_prev=g_stack, beta_prev=be_stack, alpha_prev=a_stack,
        w_off=jnp.asarray(w_off, jnp.int32), k_tiles=jnp.asarray(k_tiles, jnp.int32),
        in_dim=int(in_dim), h_dims=tuple(h_dims),
        k0_pad=int(k_pads[0]), n_hid_pad=int(n_hid_pad), n_max_pad=int(n_max_pad),
        out_pad=int(n_pads[-1]), tk=int(tk), max_k_tiles=int(max(k_tiles)),
    )


def linear_layer_forward(x, packed, *, eps=1e-5, max_tile_n=None):
    """Equivalent of LinearLayer.forward (training-mode BN), fully fused in one pallas_call."""
    n, in_dim = x.shape
    assert in_dim == packed["in_dim"]
    h_dims = packed["h_dims"]
    n_layers = len(h_dims)
    out_dim = h_dims[-1]
    k0_pad = packed["k0_pad"]
    n_hid_pad = packed["n_hid_pad"]
    n_max_pad = packed["n_max_pad"]
    out_pad = packed["out_pad"]
    tk = packed["tk"]
    max_k_tiles = packed["max_k_tiles"]
    itm = jnp.dtype(MXU_DTYPE).itemsize

    vmem_cap = _vmem_capacity_bytes()
    budget = int(0.70 * vmem_cap)

    def _vmem_needed(tile_n, n_pad):
        return (n_pad * n_hid_pad * itm            # resident prev-layer pre-activations (bf16)
                + max_k_tiles * tile_n * tk * itm  # chunked current-layer input
                + tile_n * n_max_pad * 4           # f32 matmul accumulator
                + 2 * tile_n * k0_pad * itm        # double-buffered x tile
                + 2 * tile_n * out_pad * 4         # double-buffered output tile
                + 2 * tk * n_max_pad * itm         # double-buffered weight slab
                + 3 * tile_n * n_max_pad * 4       # compiler temporaries (y, masked y, y*y)
                + 32 * n_max_pad * 4)              # per-feature stats / bias / BN blocks

    # Generation-aware row-tile cap: v5e/v6e have 128 MiB VMEM, v7x 64 MiB per TensorCore.
    if max_tile_n is not None:
        tile_cap = max(SUBLANE, _round_up(int(max_tile_n), SUBLANE))
    elif vmem_cap >= (100 << 20):
        tile_cap = 1024
    elif n_max_pad >= 2048:
        tile_cap = 128
    else:
        tile_cap = 256

    n8 = _round_up(n, SUBLANE)
    tile_n = None
    for cand in (1024, 512, 256, 128, 64, 32, 16, SUBLANE):
        c = min(cand, tile_cap, n8)
        if _vmem_needed(c, _round_up(n, c)) <= budget:
            tile_n = c
            break
    if tile_n is None:
        # TODO(synk): HBM-spill path for the resident activation slab (pl.ANY scratch +
        # manual double-buffered make_async_copy per batch tile) for very large batches;
        # refuse explicitly instead of silently thrashing VMEM.
        raise ValueError("batch too large for the VMEM-resident activation slab")

    n_pad = _round_up(n, tile_n)
    n_tiles = n_pad // tile_n
    vmem_limit = int(min(_vmem_needed(tile_n, n_pad) + (4 << 20), vmem_cap - (8 << 20)))
    vmem_limit = max(vmem_limit, 16 << 20)

    # Lane-dense bf16 input, padded rows/cols zero (padded rows are masked out of BN stats).
    x_pad = jnp.zeros((n_pad, k0_pad), MXU_DTYPE).at[:n, :in_dim].set(x.astype(MXU_DTYPE))

    kernel = functools.partial(
        _mlp_kernel,
        n_true=n, tile_n=tile_n, tk=tk, n_layers=n_layers, eps=eps,
        k0_tiles=k0_pad // tk, n_hid_k_tiles=n_hid_pad // tk,
        n_hid_pad=n_hid_pad, out_pad=out_pad, mask_last_tile=(n_pad != n))

    last = n_layers - 1

    out = pl.pallas_call(
        kernel,
        out_shape=jax.ShapeDtypeStruct((n_pad, out_pad), jnp.float32),
        grid_spec=pltpu.PrefetchScalarGridSpec(
            num_scalar_prefetch=2,                       # w_off, k_tiles -> SMEM
            grid=(n_layers, n_tiles, max_k_tiles),       # (layer phase, batch tile, K tile)
            in_specs=[
                # x: only fetched during phase 0; clamped to the last-seen block afterwards.
                pl.BlockSpec((tile_n, k0_pad),
                             lambda p, t, k, woff, kt: (jnp.where(p == 0, t, n_tiles - 1), 0)),
                # W: flat ragged pack along K; per-layer row-block offset + clamped K index
                # (clamping keeps the block index constant for inactive K steps -> no DMA).
                pl.BlockSpec((tk, n_max_pad),
                             lambda p, t, k, woff, kt: (woff[p] + jnp.minimum(k, kt[p] - 1), 0)),
                pl.BlockSpec((1, 1, n_max_pad), lambda p, t, k, woff, kt: (p, 0, 0)),  # b[p]
                pl.BlockSpec((1, 1, n_max_pad), lambda p, t, k, woff, kt: (p, 0, 0)),  # gamma[p-1]
                pl.BlockSpec((1, 1, n_max_pad), lambda p, t, k, woff, kt: (p, 0, 0)),  # beta [p-1]
                pl.BlockSpec(memory_space=pltpu.MemorySpace.SMEM),                     # alphas
            ],
            # Output only walks the batch axis on the last phase -> one writeback per tile.
            out_specs=pl.BlockSpec((tile_n, out_pad),
                                   lambda p, t, k, woff, kt: (jnp.where(p == last, t, 0), 0)),
            scratch_shapes=[
                pltpu.VMEM((n_pad, n_hid_pad), MXU_DTYPE),        # act: prev-layer pre-activations
                pltpu.VMEM((max_k_tiles, tile_n, tk), MXU_DTYPE), # h: current-layer input (K-chunked)
                pltpu.VMEM((tile_n, n_max_pad), jnp.float32),     # f32 matmul accumulator
                pltpu.VMEM((1, n_max_pad), jnp.float32),          # BN sum
                pltpu.VMEM((1, n_max_pad), jnp.float32),          # BN sum of squares
                pltpu.VMEM((1, n_max_pad), jnp.float32),          # folded BN scale
                pltpu.VMEM((1, n_max_pad), jnp.float32),          # folded BN shift
            ],
        ),
        compiler_params=pltpu.CompilerParams(
            dimension_semantics=("arbitrary", "arbitrary", "arbitrary"),  # BN reduction -> sequential
            vmem_limit_bytes=vmem_limit,
        ),
    )(packed["w_off"], packed["k_tiles"], x_pad, packed["w"], packed["b"],
      packed["gamma_prev"], packed["beta_prev"], packed["alpha_prev"])

    return out[:n, :out_dim]


def linear_layer_reference(x, params, *, eps=1e-5):
    """Pure-JAX reference mirroring the kernel's numerics (bf16 MXU operands / bf16 resident
    pre-activations, f32 accumulation, training-mode BatchNorm)."""
    o = x.astype(jnp.float32)
    n_layers = len(params)
    for i, prm in enumerate(params):
        y = jnp.dot(o.astype(MXU_DTYPE), prm["w"].astype(MXU_DTYPE),
                    preferred_element_type=jnp.float32) + prm["b"].reshape(1, -1)
        if i != n_layers - 1:
            mean = jnp.mean(y, axis=0, keepdims=True)
            var = jnp.maximum(jnp.mean(y * y, axis=0, keepdims=True) - mean * mean, 0.0)
            scale = prm["gamma"].reshape(1, -1) * lax.rsqrt(var + eps)
            shift = prm["beta"].reshape(1, -1) - mean * scale
            yq = y.astype(MXU_DTYPE).astype(jnp.float32)   # mirrors bf16 act residency
            z = yq * scale + shift
            y = jnp.where(z >= 0.0, z, prm["alpha"] * z)
        o = y
    return o


if __name__ == "__main__":
    key = jax.random.PRNGKey(0)
    kx, kp = jax.random.split(key)

    # LinearLayer(in_dim=32, h_dim=[160, 16], activation='PReLU', use_bn=True)
    # Mixed widths exercise the ragged K pack (128 vs 256) + K-tiling; batch 20 with a forced
    # 8-row tile exercises multi-tile BN statistics and the padded-row mask.
    batch, in_dim = 20, 32
    h_dims = [160, 16]

    x = jax.random.normal(kx, (batch, in_dim), jnp.float32)
    params = init_linear_layer_params(kp, in_dim, h_dims)
    packed = pack_linear_layer_params(params, in_dim)

    out = linear_layer_forward(x, packed, max_tile_n=8)
    out = jax.block_until_ready(out)
    assert out.shape == (batch, h_dims[-1]), out.shape

    ref = jax.block_until_ready(linear_layer_reference(x, params))
    max_err = float(jnp.max(jnp.abs(out - ref)))
    assert max_err < 1e-2, f"max|kernel - reference| = {max_err}"

    print("KERNEL_OK")
</pallas_src>

<mosaic_0001>
module attributes {stable_mosaic.version = 11 : i64} {
  func.func @_mlp_kernel(%arg0: i32, %arg1: i32, %arg2: i32, %arg3: memref<2xi32, #tpu.memory_space<smem>>, %arg4: memref<2xi32, #tpu.memory_space<smem>>, %arg5: memref<8x128xbf16, #tpu.memory_space<vmem>>, %arg6: memref<128x256xbf16, #tpu.memory_space<vmem>>, %arg7: memref<1x1x256xf32, #tpu.memory_space<vmem>>, %arg8: memref<1x1x256xf32, #tpu.memory_space<vmem>>, %arg9: memref<1x1x256xf32, #tpu.memory_space<vmem>>, %arg10: memref<2xf32, #tpu.memory_space<smem>>, %arg11: memref<8x128xf32, #tpu.memory_space<vmem>>, %arg12: memref<24x256xbf16, #tpu.memory_space<vmem>>, %arg13: memref<2x8x128xbf16, #tpu.memory_space<vmem>>, %arg14: memref<8x256xf32, #tpu.memory_space<vmem>>, %arg15: memref<1x256xf32, #tpu.memory_space<vmem>>, %arg16: memref<1x256xf32, #tpu.memory_space<vmem>>, %arg17: memref<1x256xf32, #tpu.memory_space<vmem>>, %arg18: memref<1x256xf32, #tpu.memory_space<vmem>>) attributes {dimension_semantics = [#tpu.dimension_semantics<arbitrary>, #tpu.dimension_semantics<arbitrary>, #tpu.dimension_semantics<arbitrary>], iteration_bounds = array<i64: 2, 3, 2>, scalar_prefetch = 2 : i64, scratch_operands = 7 : i64, tpu.core_type = #tpu.core_type<tc>, window_params = [{transform_indices = @transform_0, window_bounds = array<i64: 8, 128>}, {transform_indices = @transform_1, window_bounds = array<i64: 128, 256>}, {transform_indices = @transform_2, window_bounds = array<i64: 1, 1, 256>}, {transform_indices = @transform_3, window_bounds = array<i64: 1, 1, 256>}, {transform_indices = @transform_4, window_bounds = array<i64: 1, 1, 256>}, {transform_indices = @transform_5, window_bounds = array<i64: 2>}, {transform_indices = @transform_6, window_bounds = array<i64: 8, 128>}]} {
    %c8_i32 = arith.constant 8 : i32
    %0 = arith.muli %arg1, %c8_i32 : i32
    %1 = tpu.assume_multiple %0, 8 : i32
    %2 = arith.index_cast %arg0 : i32 to index
    %3 = memref.load %arg4[%2] : memref<2xi32, #tpu.memory_space<smem>>
    %c0_i32 = arith.constant 0 : i32
    %4 = arith.cmpi eq, %arg1, %c0_i32 : i32
    %c0_i32_0 = arith.constant 0 : i32
    %5 = arith.cmpi eq, %arg2, %c0_i32_0 : i32
    %6 = arith.andi %4, %5 : i1
    %c0_i32_1 = arith.constant 0 : i32
    %7 = arith.cmpi sgt, %arg0, %c0_i32_1 : i32
    %8 = arith.andi %6, %7 : i1
    %9 = arith.extui %8 : i1 to i32
    %c0_i32_2 = arith.constant 0 : i32
    %10 = arith.cmpi ne, %9, %c0_i32_2 : i32
    scf.if %10 {
      %c0 = arith.constant 0 : index
      %c0_20 = arith.constant 0 : index
      %44 = vector.load %arg15[%c0, %c0_20] : memref<1x256xf32, #tpu.memory_space<vmem>>, vector<1x256xf32>
      %cst = arith.constant 5.000000e-02 : f32
      %45 = vector.broadcast %cst : f32 to vector<1x256xf32>
      %46 = arith.mulf %44, %45 : vector<1x256xf32>
      %c0_21 = arith.constant 0 : index
      %c0_22 = arith.constant 0 : index
      %47 = vector.load %arg16[%c0_21, %c0_22] : memref<1x256xf32, #tpu.memory_space<vmem>>, vector<1x256xf32>
      %cst_23 = arith.constant 5.000000e-02 : f32
      %48 = vector.broadcast %cst_23 : f32 to vector<1x256xf32>
      %49 = arith.mulf %47, %48 : vector<1x256xf32>
      %50 = arith.mulf %46, %46 : vector<1x256xf32>
      %51 = arith.subf %49, %50 : vector<1x256xf32>
      %cst_24 = arith.constant 0.000000e+00 : f32
      %52 = vector.broadcast %cst_24 : f32 to vector<1x256xf32>
      %53 = arith.maximumf %51, %52 : vector<1x256xf32>
      %c0_25 = arith.constant 0 : index
      %c0_26 = arith.constant 0 : index
      %c0_27 = arith.constant 0 : index
      %54 = vector.load %arg8[%c0_25, %c0_26, %c0_27] : memref<1x1x256xf32, #tpu.memory_space<vmem>>, vector<1x1x256xf32>
      %55 = vector.shape_cast %54 : vector<1x1x256xf32> to vector<1x256xf32>
      %cst_28 = arith.constant 9.99999974E-6 : f32
      %56 = vector.broadcast %cst_28 : f32 to vector<1x256xf32>
      %57 = arith.addf %53, %56 : vector<1x256xf32>
      %58 = math.rsqrt %57 : vector<1x256xf32>
      %59 = arith.mulf %55, %58 : vector<1x256xf32>
      %c0_29 = arith.constant 0 : index
      %c0_30 = arith.constant 0 : index
      %60 = vector.load %arg17[%c0_29, %c0_30] : memref<1x256xf32, #tpu.memory_space<vmem>>, vector<1x256xf32>
      tpu.vector_store %arg17[%c0_29, %c0_30], %59 {strides = array<i32>} : memref<1x256xf32, #tpu.memory_space<vmem>>, vector<1x256xf32>,
      %c0_31 = arith.constant 0 : index
      %c0_32 = arith.constant 0 : index
      %c0_33 = arith.constant 0 : index
      %61 = vector.load %arg9[%c0_31, %c0_32, %c0_33] : memref<1x1x256xf32, #tpu.memory_space<vmem>>, vector<1x1x256xf32>
      %62 = vector.shape_cast %61 : vector<1x1x256xf32> to vector<1x256xf32>
      %63 = arith.mulf %46, %59 : vector<1x256xf32>
      %64 = arith.subf %62, %63 : vector<1x256xf32>
      %c0_34 = arith.constant 0 : index
      %c0_35 = arith.constant 0 : index
      %65 = vector.load %arg18[%c0_34, %c0_35] : memref<1x256xf32, #tpu.memory_space<vmem>>, vector<1x256xf32>
      tpu.vector_store %arg18[%c0_34, %c0_35], %64 {strides = array<i32>} : memref<1x256xf32, #tpu.memory_space<vmem>>, vector<1x256xf32>,
    } else {
    }
    %c0_i32_3 = arith.constant 0 : i32
    %11 = arith.cmpi eq, %arg1, %c0_i32_3 : i32
    %c0_i32_4 = arith.constant 0 : i32
    %12 = arith.cmpi eq, %arg2, %c0_i32_4 : i32
    %13 = arith.andi %11, %12 : i1
    %14 = arith.extui %13 : i1 to i32
    %c0_i32_5 = arith.constant 0 : i32
    %15 = arith.cmpi ne, %14, %c0_i32_5 : i32
    scf.if %15 {
      %cst = arith.constant 0.000000e+00 : f32
      %44 = vector.broadcast %cst : f32 to vector<1x256xf32>
      %c0 = arith.constant 0 : index
      %c0_20 = arith.constant 0 : index
      %45 = vector.load %arg15[%c0, %c0_20] : memref<1x256xf32, #tpu.memory_space<vmem>>, vector<1x256xf32>
      tpu.vector_store %arg15[%c0, %c0_20], %44 {strides = array<i32>} : memref<1x256xf32, #tpu.memory_space<vmem>>, vector<1x256xf32>,
      %cst_21 = arith.constant 0.000000e+00 : f32
      %46 = vector.broadcast %cst_21 : f32 to vector<1x256xf32>
      %c0_22 = arith.constant 0 : index
      %c0_23 = arith.constant 0 : index
      %47 = vector.load %arg16[%c0_22, %c0_23] : memref<1x256xf32, #tpu.memory_space<vmem>>, vector<1x256xf32>
      tpu.vector_store %arg16[%c0_22, %c0_23], %46 {strides = array<i32>} : memref<1x256xf32, #tpu.memory_space<vmem>>, vector<1x256xf32>,
    } else {
    }
    %c0_i32_6 = arith.constant 0 : i32
    %16 = arith.cmpi eq, %arg2, %c0_i32_6 : i32
    %c0_i32_7 = arith.constant 0 : i32
    %17 = arith.cmpi eq, %arg0, %c0_i32_7 : i32
    %18 = arith.andi %16, %17 : i1
    %19 = arith.extui %18 : i1 to i32
    %c0_i32_8 = arith.constant 0 : i32
    %20 = arith.cmpi ne, %19, %c0_i32_8 : i32
    scf.if %20 {
      %c0 = arith.constant 0 : index
      %c0_20 = arith.constant 0 : index
      %44 = vector.load %arg5[%c0, %c0_20] : memref<8x128xbf16, #tpu.memory_space<vmem>>, vector<8x128xbf16>
      %c0_21 = arith.constant 0 : index
      %c0_22 = arith.constant 0 : index
      %c0_23 = arith.constant 0 : index
      %45 = vector.load %arg13[%c0_21, %c0_22, %c0_23] : memref<2x8x128xbf16, #tpu.memory_space<vmem>>, vector<1x8x128xbf16>
      %46 = vector.shape_cast %45 : vector<1x8x128xbf16> to vector<8x128xbf16>
      %47 = vector.shape_cast %44 : vector<8x128xbf16> to vector<1x8x128xbf16>
      tpu.vector_store %arg13[%c0_21, %c0_22, %c0_23], %47 {strides = array<i32>} : memref<2x8x128xbf16, #tpu.memory_space<vmem>>, vector<1x8x128xbf16>,
    } else {
    }
    %c0_i32_9 = arith.constant 0 : i32
    %21 = arith.cmpi eq, %arg2, %c0_i32_9 : i32
    %c0_i32_10 = arith.constant 0 : i32
    %22 = arith.cmpi sgt, %arg0, %c0_i32_10 : i32
    %23 = arith.andi %21, %22 : i1
    %24 = arith.extui %23 : i1 to i32
    %c0_i32_11 = arith.constant 0 : i32
    %25 = arith.cmpi ne, %24, %c0_i32_11 : i32
    scf.if %25 {
      %44 = arith.index_cast %1 : i32 to index
      %c0 = arith.constant 0 : index
      %45 = vector.load %arg12[%44, %c0] : memref<24x256xbf16, #tpu.memory_space<vmem>>, vector<8x256xbf16>
      %46 = arith.extf %45 : vector<8x256xbf16> to vector<8x256xf32>
      %c0_20 = arith.constant 0 : index
      %c0_21 = arith.constant 0 : index
      %47 = vector.load %arg17[%c0_20, %c0_21] : memref<1x256xf32, #tpu.memory_space<vmem>>, vector<1x256xf32>
      %c0_22 = arith.constant 0 : index
      %c0_23 = arith.constant 0 : index
      %48 = vector.load %arg18[%c0_22, %c0_23] : memref<1x256xf32, #tpu.memory_space<vmem>>, vector<1x256xf32>
      %49 = vector.broadcast %47 : vector<1x256xf32> to vector<8x256xf32>
      %50 = arith.mulf %46, %49 : vector<8x256xf32>
      %51 = vector.broadcast %48 : vector<1x256xf32> to vector<8x256xf32>
      %52 = arith.addf %50, %51 : vector<8x256xf32>
      %53 = arith.index_cast %arg0 : i32 to index
      %54 = memref.load %arg10[%53] : memref<2xf32, #tpu.memory_space<smem>>
      %cst = arith.constant 0.000000e+00 : f32
      %55 = vector.broadcast %cst : f32 to vector<8x256xf32>
      %56 = arith.cmpf oge, %52, %55 : vector<8x256xf32>
      %57 = vector.broadcast %54 : f32 to vector<8x256xf32>
      %58 = arith.mulf %57, %52 : vector<8x256xf32>
      %59 = arith.select %56, %52, %58 : vector<8x256xi1>, vector<8x256xf32>
      %60 = arith.truncf %59 : vector<8x256xf32> to vector<8x256xbf16>
      %61 = vector.extract_strided_slice %60 {offsets = [0, 0], sizes = [8, 128], strides = [1, 1]} : vector<8x256xbf16> to vector<8x128xbf16>
      %c0_24 = arith.constant 0 : index
      %c0_25 = arith.constant 0 : index
      %c0_26 = arith.constant 0 : index
      %62 = vector.load %arg13[%c0_24, %c0_25, %c0_26] : memref<2x8x128xbf16, #tpu.memory_space<vmem>>, vector<1x8x128xbf16>
      %63 = vector.shape_cast %62 : vector<1x8x128xbf16> to vector<8x128xbf16>
      %64 = vector.shape_cast %61 : vector<8x128xbf16> to vector<1x8x128xbf16>
      tpu.vector_store %arg13[%c0_24, %c0_25, %c0_26], %64 {strides = array<i32>} : memref<2x8x128xbf16, #tpu.memory_space<vmem>>, vector<1x8x128xbf16>,
      %65 = vector.extract_strided_slice %60 {offsets = [0, 128], sizes = [8, 128], strides = [1, 1]} : vector<8x256xbf16> to vector<8x128xbf16>
      %c1 = arith.constant 1 : index
      %c0_27 = arith.constant 0 : index
      %c0_28 = arith.constant 0 : index
      %66 = vector.load %arg13[%c1, %c0_27, %c0_28] : memref<2x8x128xbf16, #tpu.memory_space<vmem>>, vector<1x8x128xbf16>
      %67 = vector.shape_cast %66 : vector<1x8x128xbf16> to vector<8x128xbf16>
      %68 = vector.shape_cast %65 : vector<8x128xbf16> to vector<1x8x128xbf16>
      tpu.vector_store %arg13[%c1, %c0_27, %c0_28], %68 {strides = array<i32>} : memref<2x8x128xbf16, #tpu.memory_space<vmem>>, vector<1x8x128xbf16>,
    } else {
    }
    %c0_i32_12 = arith.constant 0 : i32
    %26 = arith.cmpi eq, %arg2, %c0_i32_12 : i32
    %27 = arith.extui %26 : i1 to i32
    %c0_i32_13 = arith.constant 0 : i32
    %28 = arith.cmpi ne, %27, %c0_i32_13 : i32
    scf.if %28 {
      %cst = arith.constant 0.000000e+00 : f32
      %44 = vector.broadcast %cst : f32 to vector<8x256xf32>
      %c0 = arith.constant 0 : index
      %c0_20 = arith.constant 0 : index
      %c0_21 = arith.constant 0 : index
      %45 = vector.load %arg7[%c0, %c0_20, %c0_21] : memref<1x1x256xf32, #tpu.memory_space<vmem>>, vector<1x1x256xf32>
      %46 = vector.shape_cast %45 : vector<1x1x256xf32> to vector<1x256xf32>
      %47 = vector.broadcast %46 : vector<1x256xf32> to vector<8x256xf32>
      %48 = arith.addf %44, %47 : vector<8x256xf32>
      %c0_22 = arith.constant 0 : index
      %c0_23 = arith.constant 0 : index
      %49 = vector.load %arg14[%c0_22, %c0_23] : memref<8x256xf32, #tpu.memory_space<vmem>>, vector<8x256xf32>
      tpu.vector_store %arg14[%c0_22, %c0_23], %48 {strides = array<i32>} : memref<8x256xf32, #tpu.memory_space<vmem>>, vector<8x256xf32>,
    } else {
    }
    %29 = arith.cmpi slt, %arg2, %3 : i32
    %30 = arith.extui %29 : i1 to i32
    %c0_i32_14 = arith.constant 0 : i32
    %31 = arith.cmpi ne, %30, %c0_i32_14 : i32
    scf.if %31 {
      %c0 = arith.constant 0 : index
      %c0_20 = arith.constant 0 : index
      %44 = vector.load %arg14[%c0, %c0_20] : memref<8x256xf32, #tpu.memory_space<vmem>>, vector<8x256xf32>
      %45 = arith.index_cast %arg2 : i32 to index
      %c0_21 = arith.constant 0 : index
      %c0_22 = arith.constant 0 : index
      %46 = vector.load %arg13[%45, %c0_21, %c0_22] : memref<2x8x128xbf16, #tpu.memory_space<vmem>>, vector<1x8x128xbf16>
      %47 = vector.shape_cast %46 : vector<1x8x128xbf16> to vector<8x128xbf16>
      %c0_23 = arith.constant 0 : index
      %c0_24 = arith.constant 0 : index
      %48 = vector.load %arg6[%c0_23, %c0_24] : memref<128x256xbf16, #tpu.memory_space<vmem>>, vector<128x256xbf16>
      %cst = arith.constant dense<0.000000e+00> : vector<8x256xf32>
      %49 = tpu.matmul %47, %48, %cst {dimension_numbers = #tpu.dot_dimension_numbers<[1], [0], [0], [1], [0, 0, 1, 1], [], []>} : vector<8x128xbf16>, vector<128x256xbf16>, vector<8x256xf32> -> vector<8x256xf32>
      %50 = arith.addf %44, %49 : vector<8x256xf32>
      %c0_25 = arith.constant 0 : index
      %c0_26 = arith.constant 0 : index
      %51 = vector.load %arg14[%c0_25, %c0_26] : memref<8x256xf32, #tpu.memory_space<vmem>>, vector<8x256xf32>
      tpu.vector_store %arg14[%c0_25, %c0_26], %50 {strides = array<i32>} : memref<8x256xf32, #tpu.memory_space<vmem>>, vector<8x256xf32>,
    } else {
    }
    %c1_i32 = arith.constant 1 : i32
    %32 = arith.subi %3, %c1_i32 : i32
    %33 = arith.cmpi eq, %arg2, %32 : i32
    %c1_i32_15 = arith.constant 1 : i32
    %34 = arith.cmpi slt, %arg0, %c1_i32_15 : i32
    %35 = arith.andi %33, %34 : i1
    %36 = arith.extui %35 : i1 to i32
    %c0_i32_16 = arith.constant 0 : i32
    %37 = arith.cmpi ne, %36, %c0_i32_16 : i32
    scf.if %37 {
      %c0 = arith.constant 0 : index
      %c0_20 = arith.constant 0 : index
      %44 = vector.load %arg14[%c0, %c0_20] : memref<8x256xf32, #tpu.memory_space<vmem>>, vector<8x256xf32>
      %45 = arith.truncf %44 : vector<8x256xf32> to vector<8x256xbf16>
      %46 = arith.index_cast %1 : i32 to index
      %c0_21 = arith.constant 0 : index
      %47 = vector.load %arg12[%46, %c0_21] : memref<24x256xbf16, #tpu.memory_space<vmem>>, vector<8x256xbf16>
      tpu.vector_store %arg12[%46, %c0_21], %45 {strides = array<i32>} : memref<24x256xbf16, #tpu.memory_space<vmem>>, vector<8x256xbf16>,
      %c2_i32 = arith.constant 2 : i32
      %48 = arith.cmpi eq, %arg1, %c2_i32 : i32
      %49 = arith.extui %48 : i1 to i32
      %c0_i32_22 = arith.constant 0 : i32
      %50 = arith.cmpi ne, %49, %c0_i32_22 : i32
      scf.if %50 {
        %54 = tpu.iota {dimensions = array<i32: 0>} : vector<8x1xi32>
        %55 = vector.broadcast %1 : i32 to vector<8x1xi32>
        %56 = arith.addi %55, %54 : vector<8x1xi32>
        %c20_i32 = arith.constant 20 : i32
        %57 = vector.broadcast %c20_i32 : i32 to vector<8x1xi32>
        %58 = arith.cmpi slt, %56, %57 : vector<8x1xi32>
        %cst = arith.constant 0.000000e+00 : f32
        %59 = vector.shape_cast %58 : vector<8x1xi1> to vector<8x1xi1>
        %60 = vector.broadcast %59 : vector<8x1xi1> to vector<8x256xi1>
        %61 = vector.broadcast %cst : f32 to vector<8x256xf32>
        %62 = arith.select %60, %44, %61 : vector<8x256xi1>, vector<8x256xf32>
        %c0_25 = arith.constant 0 : index
        %c0_26 = arith.constant 0 : index
        %63 = vector.load %arg15[%c0_25, %c0_26] : memref<1x256xf32, #tpu.memory_space<vmem>>, vector<1x256xf32>
        %cst_27 = arith.constant dense<0.000000e+00> : vector<256xf32>
        %64 = vector.multi_reduction <add>, %62, %cst_27 [0] : vector<8x256xf32> to vector<256xf32>
        %65 = vector.shape_cast %64 : vector<256xf32> to vector<1x256xf32>
        %66 = arith.addf %63, %65 : vector<1x256xf32>
        %c0_28 = arith.constant 0 : index
        %c0_29 = arith.constant 0 : index
        %67 = vector.load %arg15[%c0_28, %c0_29] : memref<1x256xf32, #tpu.memory_space<vmem>>, vector<1x256xf32>
        tpu.vector_store %arg15[%c0_28, %c0_29], %66 {strides = array<i32>} : memref<1x256xf32, #tpu.memory_space<vmem>>, vector<1x256xf32>,
        %c0_30 = arith.constant 0 : index
        %c0_31 = arith.constant 0 : index
        %68 = vector.load %arg16[%c0_30, %c0_31] : memref<1x256xf32, #tpu.memory_space<vmem>>, vector<1x256xf32>
        %69 = arith.mulf %62, %62 : vector<8x256xf32>
        %cst_32 = arith.constant dense<0.000000e+00> : vector<256xf32>
        %70 = vector.multi_reduction <add>, %69, %cst_32 [0] : vector<8x256xf32> to vector<256xf32>
        %71 = vector.shape_cast %70 : vector<256xf32> to vector<1x256xf32>
        %72 = arith.addf %68, %71 : vector<1x256xf32>
        %c0_33 = arith.constant 0 : index
        %c0_34 = arith.constant 0 : index
        %73 = vector.load %arg16[%c0_33, %c0_34] : memref<1x256xf32, #tpu.memory_space<vmem>>, vector<1x256xf32>
        tpu.vector_store %arg16[%c0_33, %c0_34], %72 {strides = array<i32>} : memref<1x256xf32, #tpu.memory_space<vmem>>, vector<1x256xf32>,
      } else {
      }
      %c2_i32_23 = arith.constant 2 : i32
      %51 = arith.cmpi ne, %arg1, %c2_i32_23 : i32
      %52 = arith.extui %51 : i1 to i32
      %c0_i32_24 = arith.constant 0 : i32
      %53 = arith.cmpi ne, %52, %c0_i32_24 : i32
      scf.if %53 {
        %c0_25 = arith.constant 0 : index
        %c0_26 = arith.constant 0 : index
        %54 = vector.load %arg15[%c0_25, %c0_26] : memref<1x256xf32, #tpu.memory_space<vmem>>, vector<1x256xf32>
        %cst = arith.constant dense<0.000000e+00> : vector<256xf32>
        %55 = vector.multi_reduction <add>, %44, %cst [0] : vector<8x256xf32> to vector<256xf32>
        %56 = vector.shape_cast %55 : vector<256xf32> to vector<1x256xf32>
        %57 = arith.addf %54, %56 : vector<1x256xf32>
        %c0_27 = arith.constant 0 : index
        %c0_28 = arith.constant 0 : index
        %58 = vector.load %arg15[%c0_27, %c0_28] : memref<1x256xf32, #tpu.memory_space<vmem>>, vector<1x256xf32>
        tpu.vector_store %arg15[%c0_27, %c0_28], %57 {strides = array<i32>} : memref<1x256xf32, #tpu.memory_space<vmem>>, vector<1x256xf32>,
        %c0_29 = arith.constant 0 : index
        %c0_30 = arith.constant 0 : index
        %59 = vector.load %arg16[%c0_29, %c0_30] : memref<1x256xf32, #tpu.memory_space<vmem>>, vector<1x256xf32>
        %60 = arith.mulf %44, %44 : vector<8x256xf32>
        %cst_31 = arith.constant dense<0.000000e+00> : vector<256xf32>
        %61 = vector.multi_reduction <add>, %60, %cst_31 [0] : vector<8x256xf32> to vector<256xf32>
        %62 = vector.shape_cast %61 : vector<256xf32> to vector<1x256xf32>
        %63 = arith.addf %59, %62 : vector<1x256xf32>
        %c0_32 = arith.constant 0 : index
        %c0_33 = arith.constant 0 : index
        %64 = vector.load %arg16[%c0_32, %c0_33] : memref<1x256xf32, #tpu.memory_space<vmem>>, vector<1x256xf32>
        tpu.vector_store %arg16[%c0_32, %c0_33], %63 {strides = array<i32>} : memref<1x256xf32, #tpu.memory_space<vmem>>, vector<1x256xf32>,
      } else {
      }
    } else {
    }
    %c1_i32_17 = arith.constant 1 : i32
    %38 = arith.subi %3, %c1_i32_17 : i32
    %39 = arith.cmpi eq, %arg2, %38 : i32
    %c1_i32_18 = arith.constant 1 : i32
    %40 = arith.cmpi eq, %arg0, %c1_i32_18 : i32
    %41 = arith.andi %39, %40 : i1
    %42 = arith.extui %41 : i1 to i32
    %c0_i32_19 = arith.constant 0 : i32
    %43 = arith.cmpi ne, %42, %c0_i32_19 : i32
    scf.if %43 {
      %c0 = arith.constant 0 : index
      %c0_20 = arith.constant 0 : index
      %44 = vector.load %arg14[%c0, %c0_20] : memref<8x256xf32, #tpu.memory_space<vmem>>, vector<8x256xf32>
      %45 = vector.extract_strided_slice %44 {offsets = [0, 0], sizes = [8, 128], strides = [1, 1]} : vector<8x256xf32> to vector<8x128xf32>
      %c0_21 = arith.constant 0 : index
      %c0_22 = arith.constant 0 : index
      %46 = vector.load %arg11[%c0_21, %c0_22] : memref<8x128xf32, #tpu.memory_space<vmem>>, vector<8x128xf32>
      tpu.vector_store %arg11[%c0_21, %c0_22], %45 {strides = array<i32>} : memref<8x128xf32, #tpu.memory_space<vmem>>, vector<8x128xf32>,
    } else {
    }
    return
  }
  func.func @transform_0(%arg0: i32, %arg1: i32, %arg2: i32, %arg3: memref<2xi32, #tpu.memory_space<smem>>, %arg4: memref<2xi32, #tpu.memory_space<smem>>) -> (i32, i32) {
    %c0_i32 = arith.constant 0 : i32
    %0 = arith.cmpi eq, %arg0, %c0_i32 : i32
    %c2_i32 = arith.constant 2 : i32
    %1 = arith.select %0, %arg1, %c2_i32 : i32
    %c0_i32_0 = arith.constant 0 : i32
    %c0_i32_1 = arith.constant 0 : i32
    return %1, %c0_i32_0 : i32, i32
  }
  func.func @transform_1(%arg0: i32, %arg1: i32, %arg2: i32, %arg3: memref<2xi32, #tpu.memory_space<smem>>, %arg4: memref<2xi32, #tpu.memory_space<smem>>) -> (i32, i32) {
    %0 = arith.index_cast %arg0 : i32 to index
    %1 = memref.load %arg3[%0] : memref<2xi32, #tpu.memory_space<smem>>
    %2 = arith.index_cast %arg0 : i32 to index
    %3 = memref.load %arg4[%2] : memref<2xi32, #tpu.memory_space<smem>>
    %c1_i32 = arith.constant 1 : i32
    %4 = arith.subi %3, %c1_i32 : i32
    %5 = arith.minsi %arg2, %4 : i32
    %6 = arith.addi %1, %5 : i32
    %c0_i32 = arith.constant 0 : i32
    %c0_i32_0 = arith.constant 0 : i32
    return %6, %c0_i32 : i32, i32
  }
  func.func @transform_2(%arg0: i32, %arg1: i32, %arg2: i32, %arg3: memref<2xi32, #tpu.memory_space<smem>>, %arg4: memref<2xi32, #tpu.memory_space<smem>>) -> (i32, i32, i32) {
    %c0_i32 = arith.constant 0 : i32
    %c0_i32_0 = arith.constant 0 : i32
    %c0_i32_1 = arith.constant 0 : i32
    return %arg0, %c0_i32, %c0_i32_0 : i32, i32, i32
  }
  func.func @transform_3(%arg0: i32, %arg1: i32, %arg2: i32, %arg3: memref<2xi32, #tpu.memory_space<smem>>, %arg4: memref<2xi32, #tpu.memory_space<smem>>) -> (i32, i32, i32) {
    %c0_i32 = arith.constant 0 : i32
    %c0_i32_0 = arith.constant 0 : i32
    %c0_i32_1 = arith.constant 0 : i32
    return %arg0, %c0_i32, %c0_i32_0 : i32, i32, i32
  }
  func.func @transform_4(%arg0: i32, %arg1: i32, %arg2: i32, %arg3: memref<2xi32, #tpu.memory_space<smem>>, %arg4: memref<2xi32, #tpu.memory_space<smem>>) -> (i32, i32, i32) {
    %c0_i32 = arith.constant 0 : i32
    %c0_i32_0 = arith.constant 0 : i32
    %c0_i32_1 = arith.constant 0 : i32
    return %arg0, %c0_i32, %c0_i32_0 : i32, i32, i32
  }
  func.func @transform_5(%arg0: i32, %arg1: i32, %arg2: i32, %arg3: memref<2xi32, #tpu.memory_space<smem>>, %arg4: memref<2xi32, #tpu.memory_space<smem>>) -> i32 {
    %c0_i32 = arith.constant 0 : i32
    %c0_i32_0 = arith.constant 0 : i32
    return %c0_i32 : i32
  }
  func.func @transform_6(%arg0: i32, %arg1: i32, %arg2: i32, %arg3: memref<2xi32, #tpu.memory_space<smem>>, %arg4: memref<2xi32, #tpu.memory_space<smem>>) -> (i32, i32) {
    %c1_i32 = arith.constant 1 : i32
    %0 = arith.cmpi eq, %arg0, %c1_i32 : i32
    %c0_i32 = arith.constant 0 : i32
    %1 = arith.select %0, %arg1, %c0_i32 : i32
    %c0_i32_0 = arith.constant 0 : i32
    %c0_i32_1 = arith.constant 0 : i32
    return %1, %c0_i32_0 : i32, i32
  }
}

</mosaic_0001>

<bundles_post_ra>
// kernel: tpu_custom_call.1
= control target key start
LH: loop header
LB: loop body
LE: loop exit
PB: predicated region body
PF: predicated region fallthrough
CT: control target
= control target key end

     0   :  { %s2202_s0 = inlined_call_operand.hbm [shape: s32[2], index: 0, kind: input, shape index: {}]   ;;  %s2203_s2 = inlined_call_operand.hbm [shape: bf16[24,128], index: 2, kind: input, shape index: {}]   ;;  %s2204_s3 = inlined_call_operand.hbm [shape: bf16[384,256], index: 3, kind: input, shape index: {}]   ;;  %s2205_s4 = inlined_call_operand.vmem [shape: f32[2,1,256], index: 4, kind: input, shape index: {}]   ;;  %s2206_s5 = inlined_call_operand.vmem [shape: f32[2,1,256], index: 5, kind: input, shape index: {}]   ;;  %s2207_s6 = inlined_call_operand.vmem [shape: f32[2,1,256], index: 6, kind: input, shape index: {}]   ;;  %s2208_s7 = inlined_call_operand.vmem [shape: f32[2], index: 7, kind: input, shape index: {}]   ;;  %s2209_s8 = inlined_call_operand.hbm [shape: f32[24,128], index: 8, kind: output, shape index: {}]   ;;  %s2210_s1 = inlined_call_operand.vmem [shape: s32[2], index: 1, kind: input, shape index: {}]  }
   0x1   :  { %2241 = sst [smem:[#allocation45_spill]] %s2203_s2  ;;  %s1346_s29 = scalar_lea.hbm %s2202_s0, 16 }
   0x2   :  { %2242 = sst [smem:[#allocation46_spill]] %s2204_s3  ;;  %p1347_p0 = scmp.ne.s32.totalorder %s2202_s0, %s1346_s29 }
   0x3   :  { %2243 = sst [smem:[#allocation47_spill]] %s2205_s4  ;;  %p1350_p1 = scmp.lt.u32.totalorder %s1346_s29, %s2202_s0 }
   0x4   :  { %2244 = sst [smem:[#allocation48_spill]] %s2206_s5 }
   0x5   :  { %2245 = sst [smem:[#allocation49_spill]] %s2207_s6  ;;  %p1352_p2 = pnand %p1350_p1, %p1347_p0 }
   0x6   :  { %2246 = sst [smem:[#allocation50_spill]] %s2208_s7 }
   0x7   :  { %2247 = sst [smem:[#allocation51_spill]] %s2209_s8 }
   0x8   :  { %1355 = shalt.err (!%p1352_p2)  }
   0x9   :  { %s1617_s12 = smov [#allocation10]   ;;  %s15_s17 = sshll.u32 %s2210_s1, 4  ;;  %s16_s17 = int_to_ptr.vmem [resolvable:$true] %s15_s17 }
   0xa   :  { %14 = dma.hbm_to_smem %s2202_s0, 16, %s1617_s12, [#allocation9] }
   0xb   :  { %s1356_s18 = scalar_lea.vmem %s16_s17, 16  ;;  %p1361_p4 = scmp.lt.s32.totalorder %s16_s17, %s16_s17 }
   0xc   :  { %p1357_p3 = scmp.ne.s32.totalorder %s16_s17, %s1356_s18  ;;  %p1362_p5 = scmp.lt.s32.totalorder %s1356_s18, %s1356_s18 }
   0xe   :  { %p1363_p6 = por %p1362_p5, %p1361_p4 }
  0x10   :  { %p1364_p7 = pnand %p1363_p6, %p1357_p3 }
  0x12   :  { %1367 = shalt.err (!%p1364_p7)  }
  0x13   :  { %s1618_s19 = smov [#allocation11]  }
  0x14   :  { %18 = dma.vmem_to_smem %s16_s17, 16, %s1618_s19, [#allocation9] }
  0x15   :  { %1535 = dma.done.wait [#allocation9], 32 }
  0x16   :  { %1536 = vsyncadd [#allocation9], 4294967264 }
  0x17   :  { %20 = sfence }
  0x18   :  { %21 = vsyncpa [#allocation13], 0 }
  0x19   :  { %23 = vsyncpa [#allocation13 + $0x1], 0 }
  0x1a   :  { %24 = vsyncpa [#allocation17], 0 }
  0x1b   :  { %26 = vsyncpa [#allocation17 + $0x1], 0 }
  0x1c   :  { %27 = vsyncpa [#allocation15], 0 }
  0x1d   :  { %28 = vsyncpa [#allocation14], 0 }
  0x1e   :  { %30 = vsyncpa [#allocation14 + $0x1], 0  ;;  %s1689_s0 = smov 0   ;;  %s1691_s1 = smov 0  }
  0x1f   :  { %s1693_s20 = smov 0   ;;  %s1695_s21 = smov 0  }
  0x20   :  { %s1697_s22 = smov 0   ;;  %s1699_s23 = smov 0  }
  0x21   :  { %s1701_s24 = smov 0   ;;  %s1703_s25 = smov 0  }
  0x22   :  { %s1705_s26 = smov 0   ;;  %s1707_s27 = smov 0  }
  0x23   :  { %s1709_s28 = smov 0   ;;  %s1711_s29 = smov 0  }
  0x24   :  { %s1713_s30 = smov 0   ;;  %s1715_s9 = smov 0  }
  0x25   :  { %s1717_s10 = smov 0   ;;  %s1719_s11 = smov 0  }
  0x26 LB: > { %2248 = sst [smem:[#allocation29_spill]] %s1555_s0  ;;  %s1082_s12 = sadd.s32 4294967295, %s1615_s11   ;;  %s1615_s11 = sphi %s1719_s11, %s36_s11   ;;  %s1611_s10 = sphi %s1717_s10, %s2344_s10   ;;  %s1607_s9 = sphi %s1715_s9, %s2331_s9   ;;  %s1603_s30 = sphi %s1713_s30, %s2343_s30   ;;  %s1599_s29 = sphi %s1711_s29, %s2342_s29   ;;  %s1595_s28 = sphi %s1709_s28, %s2329_s28   ;;  %s1591_s27 = sphi %s1707_s27, %s2341_s27   ;;  %s1587_s26 = sphi %s1705_s26, %s2340_s26   ;;  %s1583_s25 = sphi %s1703_s25, %s2339_s25   ;;  %s1579_s24 = sphi %s1701_s24, %s2338_s24   ;;  %s1575_s23 = sphi %s1699_s23, %s2337_s23   ;;  %s1571_s22 = sphi %s1697_s22, %s2336_s22   ;;  %s1567_s21 = sphi %s1695_s21, %s2327_s21   ;;  %s1563_s20 = sphi %s1693_s20, %s2335_s20   ;;  %s1559_s1 = sphi %s1691_s1, %s2334_s1   ;;  %s1555_s0 = sphi %s1689_s0, %s2326_s0  }
  0x27   : > { %2249 = sst [smem:[#allocation30_spill]] %s1559_s1  ;;  %s1083_s13 = sadd.s32 4294967294, %s1615_s11  }
  0x28   : > { %2250 = sst [smem:[#allocation31_spill]] %s1571_s22  ;;  %p1769_p8 = scmp.eq.s32.totalorder %s1082_s12, 0 }
  0x29   : > { %2251 = sst [smem:[#allocation32_spill]] %s1591_s27  ;;  %p117_p9 = scmp.ne.s32.totalorder %s1571_s22, %s1567_s21 }
  0x2a   : > { %2252 = sst [smem:[#allocation33_spill]] %s1595_s28  ;;  %p243_p10 = scmp.ne.s32.totalorder %s1563_s20, %s1559_s1 }
  0x2b   : > { %2253 = sst [smem:[#allocation34_spill]] %s1599_s29  ;;  %p1779_p11 = por %p117_p9, %p1769_p8 }
  0x2c   : > { %2254 = sst [smem:[#allocation35_spill]] %s1607_s9  ;;  %p244_p12 = scmp.eq.s32.totalorder %s1082_s12, 11 }
  0x2d   : > { %s2255_s14 = scalar_select %p1769_p8, 1, 0 }
  0x2e   : > { %s2257_s16 = scalar_select %p1779_p11, 1, 0 }
  0x2f   : > { %2256 = sst [smem:[#allocation36_spill]] %s2255_s14  ;;  %p249_p13 = scmp.ne.s32.totalorder %s1559_s1, %s1555_s0 }
  0x30   : > { %2258 = sst [smem:[#allocation37_spill]] %s2257_s16  ;;  %p250_p0 = scmp.eq.s32.totalorder %s1083_s13, 11 }
  0x31   : > { %p1785_p1 = por %p244_p12, %p243_p10  ;;  %p1086_p2 = scmp.ge.s32.totalorder %s1615_s11, 1 }
  0x32   : > { %p1790_p3 = por %p250_p0, %p249_p13  ;;  %p257_p4 = scmp.lt.s32.totalorder %s1615_s11, 13 }
  0x33   : > { %s2259_s17 = scalar_select %p1785_p1, 1, 0 }
  0x34   : > { %s2261_s18 = scalar_select %p1790_p3, 1, 0 }
  0x35   : > { %2260 = sst [smem:[#allocation38_spill]] %s2259_s17  ;;  %s2263_s7 = sld [smem:[#allocation50_spill]] }
  0x36   : > { %2262 = sst [smem:[#allocation39_spill]] %s2261_s18  ;;  %p1798_p5 = pnand %p1086_p2, %p257_p4 }
  0x38   : > { %s2264_s8 = scalar_select %p1798_p5, 1, 0 }
  0x39   : > { %p1160_p6 = pneg %p1798_p5 }
  0x3b   : > { %s270_s15 = sshll.u32 %s2263_s7, 4  ;;  %p1161_p7 = pnand %p1160_p6, %p1769_p8  ;;  %s271_s15 = int_to_ptr.vmem [resolvable:$true] %s270_s15 }
  0x3c   : > { %s1368_s12 = scalar_lea.vmem %s271_s15, 16  ;;  %p1376_p0 = scmp.lt.s32.totalorder %s271_s15, %s271_s15 }
  0x3d   : > { %p1369_p9 = scmp.ne.s32.totalorder %s271_s15, %s1368_s12  ;;  %p1370_p10 = pneg %p1161_p7 }
  0x3e   : > { %p1377_p3 = scmp.lt.s32.totalorder %s1368_s12, %s1368_s12 }
  0x3f   : > { %p1371_p12 = pnand %p1370_p10, %p1369_p9 }
  0x40   : > { %p1378_p1 = por %p1377_p3, %p1376_p0 }
  0x41   : > { %p1372_p13 = pneg %p1371_p12 }
  0x43   : > { %p1379_p11 = pnand %p1378_p1, %p1372_p13 }
  0x45   : > { %1382 = shalt.err (!%p1379_p11)
}
  0x46   : > { %s1619_s13 = smov [#allocation18]   ;;  %s48_s19 = sadd.s32 1, %s1603_s30 }
  0x47   : > { %1163 = dma.vmem_to_smem (!%p1161_p7), %s271_s15, 16, %s1619_s13, [#allocation15]  }
  0x48   : > { %p49_p2 = scmp.ge.s32.totalorder %s48_s19, 2  ;;  %s51_s21 = sadd.s32 1, %s1607_s9 }
  0x49   : > { %s55_s12 = sadd.s32 1, %s1611_s10  ;;  %p59_p11 = scmp.eq.s32.totalorder %s1611_s10, 0 }
  0x4a   : > { %s2346_s19 = smov (%p49_p2, %s48_s19), 0  ;;  %s2348_s21 = smov (!%p49_p2, %s51_s21), %s1607_s9 }
  0x4b   : > { %2265 = sst [smem:[#allocation40_spill]] %s2346_s19  ;;  %p53_p1 = scmp.ge.s32.totalorder %s2348_s21, 3 }
  0x4c   : > { %s1814_s7 = scalar_select %p59_p11, %s1607_s9, 2 }
  0x4d   : > { %s66_s15 = sadd.s32 1, %s1587_s26  ;;  %p73_p3 = scmp.ne.s32.totalorder %s1587_s26, %s1583_s25 }
  0x4e   : > { %p74_p4 = scmp.eq.s32.totalorder %s1615_s11, 0  ;;  %s2350_s21 = smov (%p53_p1, %s2348_s21), 0 }
  0x4f   : > { %2266 = sst [smem:[#allocation41_spill]] %s2350_s21  ;;  %s2352_s12 = smov (!%p53_p1, %s55_s12), %s1611_s10 }
  0x50   : > { %p1825_p6 = por %p74_p4, %p73_p3  ;;  %p79_p7 = scmp.ne.s32.totalorder %s1583_s25, %s1579_s24 }
  0x51   : > { %p57_p9 = scmp.ge.s32.totalorder %s2352_s12, 2  ;;  %s1832_s18 = sld [smem:[#allocation10 + %s1611_s10]] }
  0x52   : > { %p1836_p10 = por %p1769_p8, %p79_p7  ;;  %s90_s17 = sld [smem:[#allocation11 + %s1611_s10]] }
  0x53   : > { %s2354_s12 = smov (%p57_p9, %s2352_s12), 0  ;;  %p111_p12 = scmp.ne.s32.totalorder %s1575_s23, %s1571_s22 }
  0x54   : > { %s2268_s0 = scalar_select %p1836_p10, 1, 0 }
  0x55   : > { %2270 = sst [smem:[#allocation43_spill]] %s2354_s12  ;;  %p61_p13 = scmp.eq.s32.totalorder %s2354_s12, 0 }
  0x56   : > { %2269 = sst [smem:[#allocation42_spill]] %s2268_s0  ;;  %p1851_p0 = por %p111_p12, %p74_p4 }
  0x57   : > { %s95_s6 = sld [smem:[#allocation10 + %s2354_s12]]  ;;  %p226_p2 = scmp.eq.s32.totalorder %s1611_s10, 1 }
  0x58   : > { %s96_s5 = sld [smem:[#allocation11 + %s2354_s12]]  ;;  %s1084_s28 = sadd.s32 4294967295, %s90_s17 }
  0x59   : > { %s62_s27 = scalar_select %p61_p13, %s2350_s21, 2 }
  0x5a   : > { %p92_p11 = scmp.lt.s32.totalorder %s1603_s30, %s1084_s28  ;;  %p228_p3 = scmp.eq.s32.totalorder %s2354_s12, 1 }
  0x5b   : > { %s63_s29 = ssub.s32 %s1814_s7, %s62_s27  ;;  %p2234_p7 = scmp.lt.s32.totalorder %s1615_s11, 12 }
  0x5c   : > { %p64_p1 = scmp.eq.s32.totalorder %s63_s29, 0  ;;  %s2275_s2 = sld [smem:[#allocation45_spill]] }
  0x5d   : > { %s93_s24 = scalar_select %p92_p11, %s1603_s30, %s1084_s28 }
  0x5e   : > { %s1862_s1 = scalar_select %p64_p1, %s1587_s26, %s66_s15  }
  0x5f   : > { %s94_s14 = sadd.s32 %s93_s24, %s1832_s18  ;;  %s1085_s16 = sadd.s32 4294967295, %s96_s5 }
  0x60   : > { %2272 = sst [smem:[#allocation44_spill]] %s1862_s1  ;;  %p98_p4 = scmp.lt.s32.totalorder %s2346_s19, %s1085_s16 }
  0x61   : > { %s227_s22 = scalar_select %p226_p2, %s1607_s9, 0 }
  0x62   : > { %s99_s17 = scalar_select %p98_p4, %s2346_s19, %s1085_s16 }
  0x63   : > { %s229_s27 = scalar_select %p228_p3, %s2350_s21, 0 }
  0x64   : > { %s100_s29 = sadd.s32 %s99_s17, %s95_s6  ;;  %s281_s28 = sand.u32 1, %s1587_s26  }
  0x65   : > { %s101_s12 = ssub.s32 %s94_s14, %s100_s29  ;;  %s230_s0 = ssub.s32 %s227_s22, %s229_s27 }
  0x66   : > { %p102_p9 = scmp.eq.s32.totalorder %s101_s12, 0  ;;  %p231_p12 = scmp.eq.s32.totalorder %s230_s0, 0 }
  0x67   : > { %s1089_s15 = sshll.u32 %s281_s28, 2  ;;  %s2273_s1 = sadd.s32 1, %s1575_s23 }
  0x68   : > { %s1874_s18 = scalar_select %p102_p9, %s1575_s23, %s2273_s1  }
  0x69   : > { %s2274_s5 = sadd.s32 1, %s1563_s20  ;;  %s1090_s9 = sshll.u32 %s1814_s7, 6 }
  0x6a   : > { %s1879_s24 = scalar_select %p231_p12, %s1563_s20, %s2274_s5  }
  0x6b   : > { %s1885_s21 = scalar_lea.hbm %s2275_s2, %s1090_s9  ;;  %s285_s6 = scalar_lea.vmem [#allocation12], %s1089_s15 }
  0x6c   : > { %s294_s22 = sshll.u32 %s285_s6, 4  ;;  %p1893_p13 = pnand %p2234_p7, %p1825_p6  ;;  %s1887_s22 = int_to_ptr.vmem [resolvable:$true] %s294_s22 }
  0x6d   : > { %p1901_p2 = pnand %p2234_p7, %p1851_p0  ;;  %s282_s1 = scalar_lea.sflag [#allocation13], %s281_s28 }
  0x6e   : > { %s1383_s9 = scalar_lea.hbm %s1885_s21, 64  ;;  %p1385_p1 = pneg %p1893_p13 }
  0x6f   : > { %s2277_s7 = scalar_select %p1901_p2, 1, 0 }
  0x70   : > { %p1384_p11 = scmp.ne.s32.totalorder %s1885_s21, %s1383_s9  ;;  %s1388_s12 = scalar_lea.hbm %s2275_s2, 192 }
  0x71   : > { %p1389_p4 = scmp.lt.u32.totalorder %s1885_s21, %s2275_s2  ;;  %p1390_p9 = scmp.lt.u32.totalorder %s1388_s12, %s1383_s9 }
  0x72   : > { %p1386_p3 = pnand %p1385_p1, %p1384_p11  ;;  %p1392_p7 = scmp.lt.u32.totalorder %s1383_s9, %s1885_s21 }
  0x73   : > { %p1391_p12 = por %p1390_p9, %p1389_p4 }
  0x74   : > { %p1387_p6 = pneg %p1386_p3 }
  0x75   : > { %p1393_p8 = por %p1392_p7, %p1391_p12 }
  0x77   : > { %p1394_p10 = pnand %p1393_p8, %p1387_p6 }
  0x79   : > { %1397 = shalt.err (!%p1394_p10)
}
  0x7a   : > { %s1398_s27 = scalar_lea.vmem %s1887_s22, 64  ;;  %s1620_s29 = smov [#allocation12]  }
  0x7b   : > { %p1399_p11 = scmp.ne.s32.totalorder %s1887_s22, %s1398_s27  ;;  %s1403_s28 = sshll.u32 %s1620_s29, 4  ;;  %s1404_s28 = int_to_ptr.vmem [resolvable:$false] %s1403_s28 }
  0x7c   : > { %s1405_s15 = scalar_lea.vmem %s1404_s28, 128  ;;  %p1406_p2 = scmp.lt.s32.totalorder %s1887_s22, %s1404_s28 }
  0x7d   : > { %p1401_p3 = pnand %p1399_p11, %p1385_p1  ;;  %p1407_p4 = scmp.lt.s32.totalorder %s1405_s15, %s1398_s27 }
  0x7f   : > { %p1402_p5 = pneg %p1401_p3  ;;  %p1408_p9 = por %p1407_p4, %p1406_p2 }
  0x81   : > { %p1409_p7 = pnand %p1408_p9, %p1402_p5 }
  0x83   : > { %1412 = shalt.err (!%p1409_p7)
}
  0x84   : > { %1167 = dma.hbm_to_vmem [thread:$0]  (!%p1893_p13), %s1885_s21, 64, %s1887_s22, %s282_s1  }
  0x85   : > { %s1150_s5 = scalar_select %p1851_p0, %s1611_s10, 0 }
  0x86   : > { %s1149_s16 = scalar_select %p1851_p0, [#allocation10], [#allocation20] }
  0x87   : > { %p2278_p8 = scmp.lt.s32.totalorder %s1615_s11, 12  ;;  %s301_s0 = sand.u32 1, %s1575_s23  }
  0x88   : > { %s1151_s6 = scalar_select %p1851_p0, [#allocation11], [#allocation21] }
  0x89   : > { %s2356_s5 = smov (!%p2278_p8, %s1150_s5), 0  ;;  %p2279_p5 = pmov %p2278_p8 }
  0x8a   : > { %s1091_s14 = sshll.u32 %s301_s0, 7  ;;  %s2281_s3 = sld [smem:[#allocation46_spill]] }
  0x8b   : > { %s2358_s6 = smov (!%p2279_p5, %s1151_s6), [#allocation23]  ;;  %p2280_p10 = pmov %p2279_p5 }
  0x8c   : > { %s307_s9 = sld [smem:[%s2358_s6 + %s2356_s5]]  ;;  %s305_s21 = scalar_lea.vmem [#allocation16], %s1091_s14 }
  0x8d   : > { %s2360_s16 = smov (!%p2280_p10, %s1149_s16), [#allocation22]  ;;  %s319_s22 = sshll.u32 %s305_s21, 4  ;;  %s1946_s22 = int_to_ptr.vmem [resolvable:$true] %s319_s22 }
  0x8e   : > { %s306_s19 = sld [smem:[%s2360_s16 + %s2356_s5]]  ;;  %s1953_s28 = scalar_lea.sflag [#allocation17], %s301_s0 }
  0x8f   : > { %p2282_p2 = scmp.ne.s32.totalorder %s2277_s7, 0 }
  0x90   : > { %s1418_s6 = scalar_lea.hbm %s2281_s3, 6144 }
  0x91   : > { %p1415_p1 = pneg %p2282_p2 }
  0x92   : > { %s1092_s12 = sadd.s32 4294967295, %s307_s9 }
  0x93   : > { %p309_p13 = scmp.lt.s32.totalorder %s1603_s30, %s1092_s12 }
  0x95   : > { %s310_s1 = scalar_select %p309_p13, %s1603_s30, %s1092_s12 }
  0x97   : > { %s311_s13 = sadd.s32 %s310_s1, %s306_s19 }
  0x98   : > { %s1137_s4 = sshll.u32 %s311_s13, 11 }
  0x99   : > { %s1951_s29 = scalar_lea.hbm %s2281_s3, %s1137_s4 }
  0x9a   : > { %s1413_s15 = scalar_lea.hbm %s1951_s29, 2048  ;;  %p1419_p11 = scmp.lt.u32.totalorder %s1951_s29, %s2281_s3 }
  0x9b   : > { %p1414_p0 = scmp.ne.s32.totalorder %s1951_s29, %s1413_s15  ;;  %p1420_p3 = scmp.lt.u32.totalorder %s1418_s6, %s1413_s15 }
  0x9c   : > { %p1422_p9 = scmp.lt.u32.totalorder %s1413_s15, %s1951_s29 }
  0x9d   : > { %p1416_p6 = pnand %p1415_p1, %p1414_p0  ;;  %p1421_p4 = por %p1420_p3, %p1419_p11 }
  0x9f   : > { %p1417_p12 = pneg %p1416_p6  ;;  %p1423_p7 = por %p1422_p9, %p1421_p4 }
  0xa1   : > { %p1424_p8 = pnand %p1423_p7, %p1417_p12 }
  0xa3   : > { %1427 = shalt.err (!%p1424_p8)
}
  0xa4   : > { %s1428_s0 = scalar_lea.vmem %s1946_s22, 2048  ;;  %s1621_s19 = smov [#allocation16]  }
  0xa5   : > { %p1429_p5 = scmp.ne.s32.totalorder %s1946_s22, %s1428_s0  ;;  %s1433_s12 = sshll.u32 %s1621_s19, 4  ;;  %s1434_s12 = int_to_ptr.vmem [resolvable:$false] %s1433_s12 }
  0xa6   : > { %s1435_s21 = scalar_lea.vmem %s1434_s12, 4096  ;;  %p1436_p0 = scmp.lt.s32.totalorder %s1946_s22, %s1434_s12 }
  0xa7   : > { %p1431_p10 = pnand %p1429_p5, %p1415_p1  ;;  %p1437_p6 = scmp.lt.s32.totalorder %s1435_s21, %s1428_s0 }
  0xa9   : > { %p1432_p13 = pneg %p1431_p10  ;;  %p1438_p11 = por %p1437_p6, %p1436_p0 }
  0xab   : > { %p1439_p3 = pnand %p1438_p11, %p1432_p13 }
  0xad   : > { %1442 = shalt.err (!%p1439_p3)
}
  0xae   : > { %s1622_s1 = smov 128   ;;  %s1623_s13 = smov 8  }
  0xaf   : > { %1174 = dma.hbm_to_vmem [thread:$0]  (!%p2282_p2), %s1951_s29, 2048, %s1946_s22, %s1953_s28, %s1622_s1, %s1622_s1, %s1623_s13  }
  0xb0   : > { %p2283_p1 = scmp.ne.s32.totalorder %s2264_s8, 0 }
  0xb1   : > { %s2284_s4 = sld [smem:[#allocation42_spill]] (!%p2283_p1)  ;;  %s354_s17 = sand.u32 (!%p2283_p1), 1, %s1583_s25  }
  0xb2   : > { %352 = sbr.rel (%p2283_p1) target bundleno = 696 (0x2b8), region = 44  ;;  %s1984_s27 = sshll.u32 (!%p2283_p1), %s354_s17, 2 }
  0xb3   : > { %s355_s15 = scalar_lea.sflag (!%p2283_p1), [#allocation13], %s354_s17 }
  0xb7   : > { %p2285_p12 = scmp.ne.s32.totalorder (!%p2283_p1), %s2284_s4, 0 }
  0xb9   : > { %1538 = dma.done.wait (%p2285_p12), %s355_s15, 64  }
  0xba   : > { %1540 = vsyncadd (%p2285_p12), %s355_s15, 4294967232  ;;  %s2286_s16 = sld [smem:[#allocation31_spill]]  ;;  %s2287_s6 = sld [smem:[#allocation37_spill]] }
  0xc0   : > { %s363_s7 = sand.u32 1, %s2286_s16   ;;  %p2288_p2 = scmp.ne.s32.totalorder %s2287_s6, 0 }
  0xc1   : > { %s1098_s22 = sshll.u32 %s363_s7, 7  ;;  %s364_s29 = scalar_lea.sflag [#allocation17], %s363_s7 }
  0xc2   : > { %s1992_s8 = scalar_lea.vmem [#allocation16], %s1098_s22 }
  0xc3   : > { %1542 = dma.done.wait (%p2288_p2), %s364_s29, 2048  }
  0xc4   : > { %1544 = vsyncadd (%p2288_p2), %s364_s29, 4294965248  ;;  %s2289_s28 = sld [smem:[#allocation36_spill]] }
  0xca   : > { %p2290_p4 = scmp.ne.s32.totalorder %s2289_s28, 0 }
  0xcc   : > { %1546 = dma.done.wait (%p2290_p4), [#allocation15], 16  }
  0xcd   : > { %1548 = vsyncadd (%p2290_p4), [#allocation15], 4294967280 }
  0xce   : > { %376 = sfence }
  0xcf   : > { %s2291_s9 = sld [smem:[#allocation30_spill]]  ;;  %s2292_s14 = sld [smem:[#allocation34_spill]] }
  0xd0   : > { %s2293_s0 = sld [smem:[#allocation33_spill]]  ;;  %s2294_s19 = sld [smem:[#allocation32_spill]] }
  0xd1   : > { %s2295_s6 = sld [smem:[#allocation47_spill]]  ;;  %s2296_s28 = sld [smem:[#allocation48_spill]] }
  0xd2   : > { %s2297_s2 = sld [smem:[#allocation49_spill]] }
  0xd5   : > { %s2240_s12 = sand.u32 1, %s2291_s9   ;;  %p427_p9 = scmp.lt.s32.totalorder %s2292_s14, 1 }
  0xd6   : > { %s2006_s21 = sshll.u32 %s2240_s12, 3  ;;  %s2009_s1 = sshll.u32 %s2293_s0, 3 }
  0xd7   : > { %s2012_s13 = sld [smem:[#allocation11 + %s2292_s14]]  ;;  %p444_p7 = scmp.eq.s32.totalorder %s2293_s0, 0 }
  0xd8   : > { %s428_s4 = scalar_select %p427_p9, %s2292_s14, 1 }
  0xd9   : > { %p445_p8 = scmp.eq.s32.totalorder %s2294_s19, 0  ;;  %p448_p5 = scmp.gt.s32.totalorder %s2292_s14, 0 }
  0xda   : > { %s2019_s17 = sshll.u32 %s428_s4, 1  ;;  %s417_s4 = scalar_lea.vmem [#allocation19], %s2006_s21 }
  0xdb   : > { %s430_s7 = scalar_lea.vmem %s2295_s6, %s2019_s17  ;;  %s434_s9 = scalar_lea.vmem %s2296_s28, %s2019_s17 }
  0xdc   : > { %s438_s3 = scalar_lea.vmem %s2297_s2, %s2019_s17  ;;  %p2036_p10 = pnand %p445_p8, %p444_p7 }
  0xde   : > { %p447_p13 = pneg %p2036_p10 }
  0xe0   : > { %p449_p0 = pnand %p448_p5, %p447_p13 }
  0xe1   : > { %v453_v0 = vld [vmem:[#allocation5] sm:$0x3] (!%p449_p0)  ;;  %v455_v1 = vld [vmem:[#allocation6] sm:$0x3] (!%p449_p0)  ;;  %v464_v8 = vlaneseq (!%p449_p0)  ;;  %v460_v9 = vld [vmem:[%s434_s9] sm:$0x3] (!%p449_p0) }
  0xe2   : > { %452 = sbr.rel (%p449_p0) target bundleno = 254 (0xfe), region = 60  ;;  %v454_v2 = vmul.f32 (!%p449_p0), 0.05, %v453_v0  ;;  %v456_v3 = vmul.f32 (!%p449_p0), 0.05, %v455_v1 }
  0xe3   : > { %vm466_vm0 = vcmp.lt.s32.totalorder (!%p449_p0), %v464_v8, 256  ;;  %v469_v12 = vld [vmem:[%s438_s3] sm:$0x3] (!%p449_p0) }
  0xe4   : > { %v457_v4 = vmul.f32 (!%p449_p0), %v454_v2, %v454_v2 }
  0xe6   : > { %v458_v5 = vsub.f32 (!%p449_p0), %v456_v3, %v457_v4 }
  0xe8   : > { %v459_v6 = vmax.f32 (!%p449_p0), %v458_v5, 0.0 }
  0xea   : > { %v461_v7 = vadd.f32 1e-05, %v459_v6 }
  0xec   : > { %1320 = vrsqrt.f32 %v461_v7 }
  0xf6   : > { %v1321_v10 = vpop.eup %1320 }
  0xf7   : > { %v463_v11 = vmul.f32 %v1321_v10, %v460_v9 }
  0xf9   : > { %468 = vst.msk [vmem:[#allocation7] sm:$0x3] %vm466_vm0, %v463_v11  ;;  %v470_v13 = vmul.f32 %v463_v11, %v454_v2 }
  0xfb   : > { %v471_v14 = vsub.f32 %v469_v12, %v470_v13 }
  0xfd   : > { %472 = vst.msk [vmem:[#allocation8] sm:$0x3] %vm466_vm0, %v471_v14 }
  0xfe PF: > { %474 = sbr.rel (%p2036_p10) target bundleno = 261 (0x105), region = 64  ;;  %v475_v15 = vlaneseq (!%p2036_p10)  ;;  %v1624_v16 = vmov (!%p2036_p10), 0.0  }
 0x100   : > { %vm477_vm1 = vcmp.lt.s32.totalorder (!%p2036_p10), %v475_v15, 256 }
 0x101   : > { %479 = vst.msk [vmem:[#allocation5] sm:$0x3] (!%p2036_p10), %vm477_vm1, %v1624_v16  ;;  %480 = vst.msk [vmem:[#allocation6] sm:$0x3] (!%p2036_p10), %vm477_vm1, %v1624_v16 }
 0x105 PF: > { %s2299_s2 = sld [smem:[#allocation34_spill]] }
 0x10b   : > { %p481_p6 = scmp.eq.s32.totalorder %s2299_s2, 0 }
 0x10d   : > { %p482_p11 = pnand %p481_p6, %p445_p8 }
 0x10e   : > { %s2301_s3 = scalar_lea.vmem (!%p482_p11), [#allocation12], %s1984_s27 }
 0x10f   : > { %485 = sbr.rel (%p482_p11) target bundleno = 278 (0x116), region = 68  ;;  %v486_v17 = vld [vmem:[%s2301_s3] sm:$0xf] (!%p482_p11) }
 0x110   : > { %487 = vst [vmem:[#allocation3] sm:$0xf] (!%p482_p11), %v486_v17 }
 0x116 PF: > { %p488_p3 = pnand %p448_p5, %p445_p8 }
 0x117   : > { %v503_v18 = vlaneseq (!%p488_p3)  ;;  %s2304_s12 = sld [smem:[#allocation34_spill]] (!%p488_p3)  ;;  %s496_s15 = scalar_lea.vmem (!%p488_p3), [#allocation2], %s2009_s1  ;;  %v500_v21 = vld [vmem:[#allocation7] sm:$0x3] (!%p488_p3)  ;;  %v501_v22 = vld [vmem:[#allocation8] sm:$0x3] (!%p488_p3) }
 0x118   : > { %491 = sbr.rel (%p488_p3) target bundleno = 298 (0x12a), region = 72  ;;  %v497_v19 = vld [vmem:[%s496_s15] sm:$0xff] (!%p488_p3) }
 0x119   : > { %v504_v20 = vshrl.u32 (!%p488_p3), %v503_v18, 7  ;;  %v498_v23 = vunpack.c.l.bf16 (!%p488_p3), %v497_v19  ;;  %v499_v24 = vunpack.c.h.bf16 (!%p488_p3), %v497_v19 }
 0x11b   : > { %v505_v25 = vsub.s32 (!%p488_p3), 0, %v504_v20  ;;  %v509_v26 = vsub.s32 (!%p488_p3), 1, %v504_v20 }
 0x11d   : > { %s528_s16 = sld [smem:[#allocation18 + %s2304_s12]] (!%p488_p3)  ;;  %v506_v27 = vrot.slane (!%p488_p3), %v500_v21, %v505_v25  ;;  %v510_v28 = vrot.slane (!%p488_p3), %v500_v21, %v509_v26  ;;  %v519_v29 = vrot.slane (!%p488_p3), %v501_v22, %v505_v25  ;;  %v523_v30 = vrot.slane (!%p488_p3), %v501_v22, %v509_v26 }
 0x11f   : > { %v513_v31 = vmul.f32 %v506_v27, %v498_v23  ;;  %v514_v32 = vmul.f32 %v510_v28, %v499_v24 }
 0x121   : > { %v526_v34 = vadd.f32 %v519_v29, %v513_v31  ;;  %v527_v35 = vadd.f32 %v523_v30, %v514_v32 }
 0x123   : > { %v531_v33 = vstv %s528_s16  ;;  %vm529_vm2 = vcmp.ge.f32.partialorder %v526_v34, 0.0  ;;  %vm530_vm3 = vcmp.ge.f32.partialorder %v527_v35, 0.0 }
 0x124   : > { %v532_v36 = vmul.f32 %v531_v33, %v526_v34  ;;  %v533_v37 = vmul.f32 %v531_v33, %v527_v35 }
 0x126   : > { %v534_v38 = vsel %vm529_vm2, %v526_v34, %v532_v36  ;;  %v535_v39 = vsel %vm530_vm3, %v527_v35, %v533_v37 }
 0x127   : > { %v1144_v40 = vpack.c.bf16 %v535_v39, %v534_v38 }
 0x129   : > { %1145 = vst [vmem:[#allocation3] sm:$0xff] %v1144_v40  }
 0x12a PF: > { %s2305_s27 = sld [smem:[#allocation32_spill]] }
 0x130   : > { %p1107_p1 = scmp.ne.s32.totalorder %s2305_s27, 0 }
 0x131   : > { %v546_v41 = vlaneseq (!%p1107_p1)  ;;  %v544_v43 = vld [vmem:[%s430_s7] sm:$0x3] (!%p1107_p1) }
 0x132   : > { %543 = sbr.rel (%p1107_p1) target bundleno = 314 (0x13a), region = 76 }
 0x133   : > { %v547_v42 = vshrl.u32 (!%p1107_p1), %v546_v41, 7 }
 0x135   : > { %v548_v44 = vsub.s32 (!%p1107_p1), 0, %v547_v42  ;;  %v552_v45 = vsub.s32 (!%p1107_p1), 1, %v547_v42 }
 0x137   : > { %v549_v46 = vrot.slane (!%p1107_p1), %v544_v43, %v548_v44  ;;  %v553_v47 = vrot.slane (!%p1107_p1), %v544_v43, %v552_v45 }
 0x139   : > { %558 = vst [vmem:[#allocation4] sm:$0xff] %v549_v46  ;;  %559 = vst [vmem:[#allocation4 + $0x8] sm:$0xff] %v553_v47 }
 0x13a PF: > { %s2307_s28 = sld [smem:[#allocation32_spill]] }
 0x140   : > { %p1108_p12 = scmp.ge.s32.totalorder %s2307_s28, %s2012_s13 }
 0x141   : > { %v1322_v48 = vld [vmem:[%s1992_s8 + $0x4] ss:$8 sps:$4 sm:$0xff] (!%p1108_p12)   ;;  %v1324_v49 = vld [vmem:[%s1992_s8] ss:$8 sps:$4 sm:$0xff] (!%p1108_p12)   ;;  %v1625_v50 = vmov (!%p1108_p12), 0   ;;  %s2308_s17 = sld [smem:[#allocation32_spill]] (!%p1108_p12) }
 0x142   : > { %563 = sbr.rel (%p1108_p12) target bundleno = 570 (0x23a), region = 80  ;;  %697 = vmatprep.mubr.bf16.mxu0 (!%p1108_p12), %v1625_v50  ;;  %665 = vmatprep.subr.bf16.mxu0 (!%p1108_p12), %v1322_v48  ;;  %v1325_v51 = vld [vmem:[%s1992_s8 + $0x14] ss:$8 sps:$4 sm:$0xff] (!%p1108_p12)   ;;  %v1327_v52 = vld [vmem:[%s1992_s8 + $0x10] ss:$8 sps:$4 sm:$0xff] (!%p1108_p12)   ;;  %v564_v2 = vld [vmem:[#allocation4] sm:$0xff] (!%p1108_p12) }
 0x143   : > { %666 = vmatpush1.bf16.msra.mxu0 (!%p1108_p12), %v1324_v49  ;;  %v1328_v53 = vld [vmem:[%s1992_s8 + $0x24] ss:$8 sps:$4 sm:$0xff] (!%p1108_p12)   ;;  %v1330_v54 = vld [vmem:[%s1992_s8 + $0x20] ss:$8 sps:$4 sm:$0xff] (!%p1108_p12)   ;;  %v1331_v55 = vld [vmem:[%s1992_s8 + $0x34] ss:$8 sps:$4 sm:$0xff] (!%p1108_p12)  }
 0x144   : > { %667 = vmatprep.subr.bf16.mxu0 (!%p1108_p12), %v1325_v51  ;;  %v1333_v56 = vld [vmem:[%s1992_s8 + $0x30] ss:$8 sps:$4 sm:$0xff] (!%p1108_p12)   ;;  %v1334_v57 = vld [vmem:[%s1992_s8 + $0x44] ss:$8 sps:$4 sm:$0xff] (!%p1108_p12)   ;;  %v1336_v58 = vld [vmem:[%s1992_s8 + $0x40] ss:$8 sps:$4 sm:$0xff] (!%p1108_p12)  }
 0x145   : > { %v1337_v59 = vld [vmem:[%s1992_s8 + $0x54] ss:$8 sps:$4 sm:$0xff] (!%p1108_p12)   ;;  %v1339_v60 = vld [vmem:[%s1992_s8 + $0x50] ss:$8 sps:$4 sm:$0xff] (!%p1108_p12)   ;;  %v1340_v61 = vld [vmem:[%s1992_s8 + $0x64] ss:$8 sps:$4 sm:$0xff] (!%p1108_p12)  }
 0x146   : > { %v1342_v62 = vld [vmem:[%s1992_s8 + $0x60] ss:$8 sps:$4 sm:$0xff] (!%p1108_p12)   ;;  %v1343_v63 = vld [vmem:[%s1992_s8 + $0x74] ss:$8 sps:$4 sm:$0xff] (!%p1108_p12)   ;;  %v1345_v0 = vld [vmem:[%s1992_s8 + $0x70] ss:$8 sps:$4 sm:$0xff] (!%p1108_p12)  }
 0x147   : > { %668 = vmatpush1.bf16.msra.mxu0 (!%p1108_p12), %v1327_v52  ;;  %s1109_s7 = sshll.u32 (!%p1108_p12), %s2308_s17, 2  ;;  %v565_v3 = vld [vmem:[#allocation4 + $0x8] sm:$0xff] (!%p1108_p12) }
 0x148   : > { %669 = vmatprep.subr.bf16.mxu0 (!%p1108_p12), %v1328_v53  ;;  %s567_s9 = scalar_lea.vmem (!%p1108_p12), [#allocation3], %s1109_s7 }
 0x149   : > { %v568_v1 = vld [vmem:[%s567_s9] sm:$0xf] }
 0x14b   : > { %670 = vmatpush1.bf16.msra.mxu0 %v1330_v54 }
 0x14c   : > { %671 = vmatprep.subr.bf16.mxu0 %v1331_v55 }
 0x14f   : > { %672 = vmatpush1.bf16.msra.mxu0 %v1333_v56 }
 0x150   : > { %673 = vmatprep.subr.bf16.mxu0 %v1334_v57 }
 0x153   : > { %674 = vmatpush1.bf16.msra.mxu0 %v1336_v58 }
 0x154   : > { %675 = vmatprep.subr.bf16.mxu0 %v1337_v59 }
 0x157   : > { %676 = vmatpush1.bf16.msra.mxu0 %v1339_v60 }
 0x158   : > { %677 = vmatprep.subr.bf16.mxu0 %v1340_v61 }
 0x15b   : > { %678 = vmatpush1.bf16.msra.mxu0 %v1342_v62 }
 0x15c   : > { %679 = vmatprep.subr.bf16.mxu0 %v1343_v63 }
 0x15f   : > { %680 = vmatpush1.bf16.msra.mxu0 %v1345_v0 }
 0x162   : > { %698 = vmatmul.mubr.bf16.vlgmr.msra.gmra.mrb[0].mxu0 %v568_v1 }
 0x235   : > { %v699_v4 = vpop.f32.mrb[0].mxu0 }
 0x236   : > { %v706_v5 = vadd.f32 %v699_v4, %v564_v2  ;;  %v701_v6 = vpop.f32.mrb[1].mxu0 }
 0x237   : > { %v707_v7 = vadd.f32 %v701_v6, %v565_v3  ;;  %v703_v8 = vpop.f32.mrb[2].mxu0 }
 0x238   : > { %708 = vst [vmem:[#allocation4] sm:$0xff] %v706_v5  ;;  %v704_v9 = vpop.f32.mrb[3].mxu0 }
 0x239   : > { %709 = vst [vmem:[#allocation4 + $0x8] sm:$0xff] %v707_v7 }
 0x23a PF: > { %s2309_s0 = sld [smem:[#allocation32_spill]]  ;;  %s1126_s8 = sadd.s32 4294967295, %s2012_s13 }
 0x240   : > { %p2085_p2 = scmp.eq.s32.totalorder %s2309_s0, %s1126_s8 }
 0x242   : > { %p713_p4 = pnand %p2085_p2, %p427_p9 }
 0x243   : > { %v2093_v10 = vld [vmem:[#allocation4] sm:$0xff] (!%p713_p4)  ;;  %v2095_v11 = vld [vmem:[#allocation4 + $0x8] sm:$0xff] (!%p713_p4)  ;;  %s731_s3 = scalar_lea.vmem (!%p713_p4), [#allocation2], %s2009_s1  ;;  %s2312_s13 = sld [smem:[#allocation33_spill]] (!%p713_p4) }
 0x244   : > { %716 = sbr.rel (%p713_p4) target bundleno = 649 (0x289), region = 84  ;;  %v1139_v12 = vpack.c.bf16 (!%p713_p4), %v2095_v11, %v2093_v10 }
 0x246   : > { %732 = vst [vmem:[%s731_s3] sm:$0xff] (!%p713_p4), %v1139_v12 }
 0x249   : > { %p1130_p7 = scmp.ne.s32.totalorder (!%p713_p4), %s2312_s13, 2 }
 0x24b   : > { %736 = sbr.rel (%p1130_p7) target bundleno = 618 (0x26a), region = 88  ;;  %v737_v13 = vlaneseq (!%p1130_p7)  ;;  %v739_v14 = vstv (!%p1130_p7), %s2009_s1  ;;  %v1626_v23 = vmov (!%p1130_p7), 1966171168   ;;  %v746_v52 = vld [vmem:[#allocation5] sm:$0x3] (!%p1130_p7) }
 0x24c   : > { %v763_v24 = vunpack.c.l.s4 (!%p1130_p7), %v1626_v23  ;;  %v783_v55 = vld [vmem:[#allocation6] sm:$0x3] (!%p1130_p7) }
 0x24d   : > { %v738_v15 = vshrl.u32 (!%p1130_p7), %v737_v13, 7  ;;  %vm780_vm5 = vcmp.lt.s32.totalorder (!%p1130_p7), %v737_v13, 256 }
 0x24e   : > { %v764_v33 = vunpack.c.0.s8 (!%p1130_p7), %v763_v24 }
 0x24f   : > { %v740_v16 = vadd.s32 (!%p1130_p7), %v739_v14, %v738_v15 }
 0x250   : > { %v767_v42 = vsub.s32 (!%p1130_p7), %v764_v33, %v738_v15 }
 0x251   : > { %vm741_vm4 = vcmp.lt.s32.totalorder (!%p1130_p7), %v740_v16, 20 }
 0x252   : > { %v744_v17 = vsel %vm741_vm4, %v2093_v10, 0.0  ;;  %v745_v18 = vsel %vm741_vm4, %v2095_v11, 0.0 }
 0x253   : > { %v747_v19 = vrot.slane %v744_v17, 4  ;;  %v753_v20 = vrot.slane %v745_v18, 4  ;;  %v784_v21 = vmul.f32 %v744_v17, %v744_v17  ;;  %v785_v22 = vmul.f32 %v745_v18, %v745_v18 }
 0x255   : > { %v748_v25 = vadd.f32 %v747_v19, %v744_v17  ;;  %v754_v26 = vadd.f32 %v753_v20, %v745_v18  ;;  %v786_v27 = vrot.slane %v784_v21, 4  ;;  %v792_v28 = vrot.slane %v785_v22, 4 }
 0x257   : > { %v749_v29 = vrot.slane %v748_v25, 2  ;;  %v755_v30 = vrot.slane %v754_v26, 2  ;;  %v787_v31 = vadd.f32 %v786_v27, %v784_v21  ;;  %v793_v32 = vadd.f32 %v792_v28, %v785_v22 }
 0x259   : > { %v750_v34 = vadd.f32 %v749_v29, %v748_v25  ;;  %v756_v35 = vadd.f32 %v755_v30, %v754_v26  ;;  %v788_v36 = vrot.slane %v787_v31, 2  ;;  %v794_v37 = vrot.slane %v793_v32, 2 }
 0x25b   : > { %v751_v38 = vrot.slane %v750_v34, 1  ;;  %v757_v39 = vrot.slane %v756_v35, 1  ;;  %v789_v40 = vadd.f32 %v788_v36, %v787_v31  ;;  %v795_v41 = vadd.f32 %v794_v37, %v793_v32 }
 0x25d   : > { %v752_v43 = vadd.f32 %v751_v38, %v750_v34  ;;  %v758_v44 = vadd.f32 %v757_v39, %v756_v35  ;;  %v790_v45 = vrot.slane %v789_v40, 1  ;;  %v796_v46 = vrot.slane %v795_v41, 1 }
 0x25f   : > { %v761_v47 = vcombine.low %v752_v43, %v758_v44  ;;  %v791_v48 = vadd.f32 %v790_v45, %v789_v40  ;;  %v797_v49 = vadd.f32 %v796_v46, %v795_v41 }
 0x261   : > { %v768_v50 = vrot.slane %v761_v47, %v767_v42  ;;  %v800_v51 = vcombine.low %v791_v48, %v797_v49 }
 0x263   : > { %v775_v53 = vrot.slane %v768_v50, %v767_v42  ;;  %v807_v54 = vrot.slane %v800_v51, %v767_v42 }
 0x265   : > { %v777_v56 = vadd.f32 %v775_v53, %v746_v52  ;;  %v814_v57 = vrot.slane %v807_v54, %v767_v42 }
 0x267   : > { %782 = vst.msk [vmem:[#allocation5] sm:$0x3] %vm780_vm5, %v777_v56  ;;  %v816_v58 = vadd.f32 %v814_v57, %v783_v55 }
 0x269   : > { %817 = vst.msk [vmem:[#allocation6] sm:$0x3] %vm780_vm5, %v816_v58 }
 0x26a PF: > { %s2313_s1 = sld [smem:[#allocation33_spill]] }
 0x270   : > { %p1131_p9 = scmp.eq.s32.totalorder %s2313_s1, 2 }
 0x271   : > { %v823_v59 = vrot.slane (!%p1131_p9), %v2093_v10, 4  ;;  %v829_v60 = vrot.slane (!%p1131_p9), %v2095_v11, 4  ;;  %v860_v61 = vmul.f32 (!%p1131_p9), %v2093_v10, %v2093_v10  ;;  %v861_v62 = vmul.f32 (!%p1131_p9), %v2095_v11, %v2095_v11  ;;  %v822_v29 = vld [vmem:[#allocation5] sm:$0x3] (!%p1131_p9)  ;;  %v859_v34 = vld [vmem:[#allocation6] sm:$0x3] (!%p1131_p9) }
 0x272   : > { %821 = sbr.rel (%p1131_p9) target bundleno = 649 (0x289), region = 92  ;;  %v1627_v1 = vmov (!%p1131_p9), 1966171168   ;;  %v841_v3 = vlaneseq (!%p1131_p9) }
 0x273   : > { %v824_v63 = vadd.f32 (!%p1131_p9), %v823_v59, %v2093_v10  ;;  %v830_v0 = vadd.f32 (!%p1131_p9), %v829_v60, %v2095_v11  ;;  %v839_v2 = vunpack.c.l.s4 (!%p1131_p9), %v1627_v1  ;;  %v862_v4 = vrot.slane (!%p1131_p9), %v860_v61, 4 }
 0x274   : > { %v868_v5 = vrot.slane (!%p1131_p9), %v861_v62, 4  ;;  %v842_v15 = vshrl.u32 (!%p1131_p9), %v841_v3, 7  ;;  %vm856_vm6 = vcmp.lt.s32.totalorder (!%p1131_p9), %v841_v3, 256 }
 0x275   : > { %v825_v6 = vrot.slane (!%p1131_p9), %v824_v63, 2  ;;  %v831_v7 = vrot.slane (!%p1131_p9), %v830_v0, 2  ;;  %v863_v8 = vadd.f32 (!%p1131_p9), %v862_v4, %v860_v61  ;;  %v840_v14 = vunpack.c.0.s8 (!%p1131_p9), %v839_v2 }
 0x276   : > { %v869_v9 = vadd.f32 (!%p1131_p9), %v868_v5, %v861_v62 }
 0x277   : > { %v826_v12 = vadd.f32 (!%p1131_p9), %v825_v6, %v824_v63  ;;  %v832_v13 = vadd.f32 (!%p1131_p9), %v831_v7, %v830_v0  ;;  %v864_v16 = vrot.slane (!%p1131_p9), %v863_v8, 2  ;;  %v843_v22 = vsub.s32 (!%p1131_p9), %v840_v14, %v842_v15 }
 0x278   : > { %v870_v17 = vrot.slane (!%p1131_p9), %v869_v9, 2 }
 0x279   : > { %v827_v18 = vrot.slane %v826_v12, 1  ;;  %v833_v19 = vrot.slane %v832_v13, 1  ;;  %v865_v10 = vadd.f32 %v864_v16, %v863_v8 }
 0x27a   : > { %v871_v20 = vadd.f32 %v870_v17, %v869_v9 }
 0x27b   : > { %v828_v11 = vadd.f32 %v827_v18, %v826_v12  ;;  %v834_v21 = vadd.f32 %v833_v19, %v832_v13  ;;  %v866_v23 = vrot.slane %v865_v10, 1 }
 0x27c   : > { %v872_v24 = vrot.slane %v871_v20, 1 }
 0x27d   : > { %v837_v25 = vcombine.low %v828_v11, %v834_v21  ;;  %v867_v26 = vadd.f32 %v866_v23, %v865_v10 }
 0x27e   : > { %v873_v27 = vadd.f32 %v872_v24, %v871_v20 }
 0x27f   : > { %v844_v28 = vrot.slane %v837_v25, %v843_v22 }
 0x280   : > { %v876_v30 = vcombine.low %v867_v26, %v873_v27 }
 0x281   : > { %v851_v31 = vrot.slane %v844_v28, %v843_v22 }
 0x282   : > { %v883_v32 = vrot.slane %v876_v30, %v843_v22 }
 0x283   : > { %v853_v33 = vadd.f32 %v851_v31, %v822_v29 }
 0x284   : > { %v890_v35 = vrot.slane %v883_v32, %v843_v22 }
 0x285   : > { %858 = vst.msk [vmem:[#allocation5] sm:$0x3] %vm856_vm6, %v853_v33 }
 0x286   : > { %v892_v36 = vadd.f32 %v890_v35, %v859_v34 }
 0x288   : > { %893 = vst.msk [vmem:[#allocation6] sm:$0x3] %vm856_vm6, %v892_v36 }
 0x289 PF: > { %s2314_s14 = sld [smem:[#allocation34_spill]] }
 0x28f   : > { %p894_p8 = scmp.eq.s32.totalorder %s2314_s14, 1 }
 0x291   : > { %p895_p5 = pnand %p894_p8, %p2085_p2 }
 0x292   : > { %v899_v37 = vld [vmem:[#allocation4] sm:$0xff] (!%p895_p5) }
 0x293   : > { %898 = sbr.rel (%p895_p5) target bundleno = 666 (0x29a), region = 96  ;;  %900 = vst [vmem:[%s417_s4] sm:$0xff] (!%p895_p5), %v899_v37 }
 0x29a PF: > { %s2315_s19 = sld [smem:[#allocation33_spill]]  ;;  %s2316_s12 = sld [smem:[#allocation30_spill]] }
 0x29b   : > { %s2317_s15 = sld [smem:[#allocation38_spill]]  ;;  %s917_s16 = sshll.u32 %s417_s4, 4  ;;  %s2121_s16 = int_to_ptr.vmem [resolvable:$true] %s917_s16 }
 0x29c   : > { %s2318_s29 = sld [smem:[#allocation51_spill]]  ;;  %s1443_s0 = scalar_lea.vmem %s2121_s16, 128 }
 0x29d   : > { %p1444_p10 = scmp.ne.s32.totalorder %s2121_s16, %s1443_s0  ;;  %s1628_s21 = smov [#allocation19]  }
 0x29e   : > { %s1447_s4 = sshll.u32 %s1628_s21, 4  ;;  %s1448_s4 = int_to_ptr.vmem [resolvable:$false] %s1447_s4 }
 0x29f   : > { %s1449_s2 = scalar_lea.vmem %s1448_s4, 256  ;;  %p1450_p11 = scmp.lt.s32.totalorder %s2121_s16, %s1448_s4 }
 0x2a0   : > { %s2362_s19 = smov (!%p894_p8, %s2315_s19), 0  ;;  %s2320_s7 = sand.u32 1, %s2316_s12  }
 0x2a1   : > { %s1133_s27 = sshll.u32 %s2362_s19, 7  ;;  %s902_s9 = scalar_lea.sflag [#allocation14], %s2320_s7 }
 0x2a2   : > { %s2319_s17 = smov %s2318_s29  ;;  %s915_s28 = scalar_lea.hbm %s2318_s29, %s1133_s27 }
 0x2a3   : > { %p2321_p13 = scmp.ne.s32.totalorder %s2317_s15, 0  ;;  %p1451_p3 = scmp.lt.s32.totalorder %s1449_s2, %s1443_s0 }
 0x2a5   : > { %p1445_p0 = pnand %p1444_p10, %p2321_p13  ;;  %p1452_p1 = por %p1451_p3, %p1450_p11 }
 0x2a7   : > { %p1446_p6 = pneg %p1445_p0 }
 0x2a9   : > { %p1453_p12 = pnand %p1452_p1, %p1446_p6 }
 0x2ab   : > { %1456 = shalt.err (!%p1453_p12)
}
 0x2ac   : > { %s1457_s8 = scalar_lea.hbm %s915_s28, 128  ;;  %s1461_s13 = scalar_lea.hbm %s2319_s17, 384 }
 0x2ad   : > { %p1458_p2 = scmp.ne.s32.totalorder %s915_s28, %s1457_s8  ;;  %p1462_p9 = scmp.lt.u32.totalorder %s915_s28, %s2319_s17 }
 0x2ae   : > { %p1463_p8 = scmp.lt.u32.totalorder %s1461_s13, %s1457_s8  ;;  %p1465_p10 = scmp.lt.u32.totalorder %s1457_s8, %s915_s28 }
 0x2af   : > { %p1459_p4 = pnand %p1458_p2, %p2321_p13 }
 0x2b0   : > { %p1464_p5 = por %p1463_p8, %p1462_p9 }
 0x2b1   : > { %p1460_p7 = pneg %p1459_p4 }
 0x2b2   : > { %p1466_p0 = por %p1465_p10, %p1464_p5 }
 0x2b4   : > { %p1467_p6 = pnand %p1466_p0, %p1460_p7 }
 0x2b6   : > { %1470 = shalt.err (!%p1467_p6)
}
 0x2b7   : > { %1158 = dma.vmem_to_hbm [thread:$0]  (%p2321_p13), %s2121_s16, 128, %s915_s28, %s902_s9  }
 0x2b8 PF: > { %s2322_s19 = sld [smem:[#allocation29_spill]]  ;;  %s2323_s12 = sld [smem:[#allocation39_spill]] }
 0x2b9   : > { %p1182_p11 = scmp.ge.s32.totalorder %s1615_s11, 2 }
 0x2be   : > { %s929_s27 = sand.u32 1, %s2322_s19   ;;  %p2324_p3 = scmp.ne.s32.totalorder %s2323_s12, 0 }
 0x2bf   : > { %s930_s6 = scalar_lea.sflag [#allocation14], %s929_s27 }
 0x2c0   : > { %p1176_p1 = pnand %p1182_p11, %p2324_p3 }
 0x2c2   : > { %1550 = dma.done.wait (!%p1176_p1), %s930_s6, 128  }
 0x2c3   : > { %1552 = vsyncadd (!%p1176_p1), %s930_s6, 4294967168  ;;  %s36_s11 = sadd.s32 1, %s1615_s11   ;;  %s2326_s0 = sld [smem:[#allocation30_spill]] }
 0x2c4   : > { %p2149_p12 = scmp.ge.s32.totalorder %s36_s11, 14   ;;  %s2327_s21 = sld [smem:[#allocation31_spill]] }
 0x2c5   : > { %s2328_s15 = sld [smem:[#allocation44_spill]]  ;;  %s2329_s28 = sld [smem:[#allocation35_spill]] }
 0x2c6   : > { %s2330_s16 = sld [smem:[#allocation40_spill]]  ;;  %s2331_s9 = sld [smem:[#allocation41_spill]] }
 0x2c7   : > { %s2332_s7 = sld [smem:[#allocation43_spill]]  ;;  %s2334_s1 = smov %s1563_s20 }
 0x2c8   : > { %s2335_s20 = smov %s1879_s24  ;;  %s2336_s22 = smov %s1575_s23 }
 0x2c9   : > { %s2337_s23 = smov %s1874_s18  ;;  %s2338_s24 = smov %s1583_s25 }
 0x2ca   : > { %s2339_s25 = smov %s1587_s26  ;;  %s2341_s27 = smov %s1603_s30 }
 0x2cb   : > { %s2340_s26 = smov %s2328_s15  ;;  %s2342_s29 = smov %s1611_s10 }
 0x2cc   : > { %s2343_s30 = smov %s2330_s16  ;;  %35 = sbr.rel (!%p2149_p12) target bundleno = 38 (0x26), region = 160 }
 0x2cd   : > { %s2344_s10 = smov %s2332_s7 }
 0x2d3   :  { %935 = vsyncpa [#allocation13], 1 }
 0x2d4   :  { %937 = vsyncpa [#allocation13 + $0x1], 1 }
 0x2d5   :  { %938 = vsyncpa [#allocation17], 1 }
 0x2d6   :  { %940 = vsyncpa [#allocation17 + $0x1], 1 }
 0x2d7   :  { %941 = vsyncpa [#allocation14], 1 }
 0x2d8   :  { %943 = vsyncpa [#allocation14 + $0x1], 1 }
 0x2d9   :  { %944 = vsyncpa [#allocation15], 1 }
 0x2da   :  { %946 = vsyncpa [#allocation15 + $0x1], 1 }

</bundles_post_ra>
